<compile_context>
chip_gen: v6e
topology: v6e:2x2x1
jax: 0.10.0
libtpu: 0.0.40
codegen_flags: <defaults>
</compile_context>

<pallas_src>
import functools

import jax
import jax.numpy as jnp
from jax.experimental import pallas as pl
from jax.experimental.pallas import tpu as pltpu

EPS = 1e-5
LANE = 128
ACT_DTYPE = jnp.bfloat16     # inter-stage activation storage (halves HBM traffic)
MXU_DTYPE = jnp.bfloat16     # matmul operand dtype (f32 accumulation on the MXU)


def _round_up(x, m):
    return (x + m - 1) // m * m


def _tpu_config():
    """Chip-aware VMEM limit and depthwise-compute dtype."""
    try:
        kind = jax.devices()[0].device_kind.lower()
    except Exception:
        kind = ""
    try:
        vmem_bytes = int(pltpu.get_tpu_info().vmem_capacity_bytes)
    except Exception:
        vmem_bytes = 128 * 2**20 if ("v5" in kind or "v6" in kind) else 64 * 2**20
    vmem_limit = max(32 * 2**20, vmem_bytes - 16 * 2**20)
    # bf16 VPU is only on v6e/v7x; keep the depthwise roll+MAC path f32 elsewhere.
    dw_dtype = jnp.bfloat16 if (("v6" in kind) or ("v7" in kind)) else jnp.float32
    return vmem_limit, dw_dtype


# ------------------------------- Pallas kernels -------------------------------

def _stage_kernel(*refs, K, pad, T, TL, apply_input_bn_relu, compute_residual,
                  dw_dtype):
    """One Conv stage.  grid = (batch, cout_tile); depthwise work runs once per
    batch element (first cout tile) into a VMEM scratch; every cout tile then
    does one (TCO,Cin)@(Cin,TL) MXU matmul + BN partial sums."""
    it = iter(refs)
    a_ref = next(it)                       # (1, Cin, TL)   ACT_DTYPE
    wdw_ref = next(it)                     # (K, Cin, 1)    f32
    wpw_ref = next(it)                     # (TCO, Cin)     bf16
    bn_ref = wres_ref = None
    if apply_input_bn_relu:
        bn_ref = next(it)                  # (2, Cin, 1)    f32  [scale; shift]
    if compute_residual:
        wres_ref = next(it)                # (TCO, Cin)     bf16
    y_ref = next(it)                       # (1, TCO, TL)   ACT_DTYPE
    s_ref = next(it)                       # (1, TCO, 1)    f32
    ss_ref = next(it)                      # (1, TCO, 1)    f32
    if compute_residual:
        res_ref = next(it)                 # (1, TCO, TL)   ACT_DTYPE
        rs_ref = next(it)                  # (1, TCO, 1)    f32
        rss_ref = next(it)                 # (1, TCO, 1)    f32
    acc_ref = next(it)                     # (Cin, TL)      bf16 VMEM scratch

    # Valid-time mask: valid data lives at lanes [0, T); [T, TL) is padding.
    lane = jax.lax.broadcasted_iota(jnp.int32, (1, TL), 1)
    mask = (lane < T).astype(jnp.float32)

    # Previous stage's BN affine + ReLU + depthwise conv: once per batch element.
    @pl.when(pl.program_id(1) == 0)
    def _depthwise():
        if apply_input_bn_relu:
            a = a_ref[0].astype(jnp.float32)
            # Re-zero padding lanes so the conv sees "same" zero padding.
            a = jnp.maximum(a * bn_ref[0] + bn_ref[1], 0.0) * mask
            a = a.astype(dw_dtype)
        else:
            a = a_ref[0].astype(dw_dtype)  # stage-0 input: pad lanes already zero
        # K circular lane rolls (XLU slot) + per-channel MACs (f32 accumulation).
        # Output lanes [0, T) only ever read valid or zero-padded lanes.
        acc = a * wdw_ref[pad]
        for k in range(K):
            if k == pad:
                continue
            acc = acc + pltpu.roll(a, (pad - k) % TL, axis=1) * wdw_ref[k]
        acc_ref[...] = acc.astype(acc_ref.dtype)

    # Pointwise 1x1 conv for this Cout tile: bf16 MXU matmul, f32 accumulation.
    y = jnp.dot(wpw_ref[...], acc_ref[...], preferred_element_type=jnp.float32)
    ym = y * mask
    y_ref[0] = y.astype(y_ref.dtype)
    s_ref[0] = jnp.sum(ym, axis=1, keepdims=True)
    ss_ref[0] = jnp.sum(ym * ym, axis=1, keepdims=True)

    if compute_residual:
        r = jnp.dot(wres_ref[...], a_ref[0].astype(MXU_DTYPE),
                    preferred_element_type=jnp.float32)
        rm = r * mask
        res_ref[0] = r.astype(res_ref.dtype)
        rs_ref[0] = jnp.sum(rm, axis=1, keepdims=True)
        rss_ref[0] = jnp.sum(rm * rm, axis=1, keepdims=True)


def _finalize_kernel(y_ref, res_ref, ybn_ref, rbn_ref, o_ref, *, T):
    """out = relu(BN_last(y) + BN_res(res)), sliced to the valid [0, T) lanes."""
    y = y_ref[0].astype(jnp.float32) * ybn_ref[0] + ybn_ref[1]
    r = res_ref[0].astype(jnp.float32) * rbn_ref[0] + rbn_ref[1]
    o_ref[0] = jnp.maximum(y + r, 0.0)[:, :T].astype(o_ref.dtype)


# --------------------------------- wrappers -----------------------------------

def _stats_to_affine(s, ss, gamma, beta, n, eps=EPS):
    """Fold training-mode BatchNorm (global (B,T) stats) into a packed (2,C,1)
    [scale; shift] so the consuming kernel just applies y*scale + shift."""
    s = jnp.sum(s, axis=0)                          # (C, 1)
    ss = jnp.sum(ss, axis=0)                        # (C, 1)
    mean = s / n
    # Biased variance (PyTorch training-mode BN normalization). Fine at these
    # magnitudes; for very long T switch to a two-pass / Welford reduction.
    var = jnp.maximum(ss / n - mean * mean, 0.0)
    scale = gamma.reshape(-1, 1).astype(jnp.float32) * jax.lax.rsqrt(var + eps)
    shift = beta.reshape(-1, 1).astype(jnp.float32) - mean * scale
    return jnp.stack([scale, shift])                # (2, C, 1)


def _stage_call(a, w_dw, w_pw, *, T, pad, cout_tile, vmem_limit, dw_dtype,
                in_affine=None, w_res=None):
    """Launch one Conv stage (optionally fused with the residual 1x1 conv)."""
    B, Cin, TL = a.shape
    Cout = w_pw.shape[0]
    K = w_dw.shape[1]
    apply_in = in_affine is not None
    do_res = w_res is not None
    # Cout tile must be a multiple of 16 so bf16 output blocks stay aligned to
    # the native (16,128) packed tile; otherwise fall back to the full Cout.
    if cout_tile and Cout % cout_tile == 0 and cout_tile % 16 == 0:
        tco = cout_tile
    else:
        tco = Cout
    nco = Cout // tco

    wdw = jnp.transpose(w_dw).reshape(K, Cin, 1).astype(jnp.float32)
    wpw = w_pw.astype(MXU_DTYPE)

    in_specs = [
        pl.BlockSpec((1, Cin, TL), lambda b, j: (b, 0, 0)),   # resident across j
        pl.BlockSpec((K, Cin, 1), lambda b, j: (0, 0, 0)),
        pl.BlockSpec((tco, Cin), lambda b, j: (j, 0)),
    ]
    args = [a, wdw, wpw]
    if apply_in:
        in_specs.append(pl.BlockSpec((2, Cin, 1), lambda b, j: (0, 0, 0)))
        args.append(in_affine)
    if do_res:
        in_specs.append(pl.BlockSpec((tco, Cin), lambda b, j: (j, 0)))
        args.append(w_res.astype(MXU_DTYPE))

    act_out = jax.ShapeDtypeStruct((B, Cout, TL), ACT_DTYPE)
    sum_out = jax.ShapeDtypeStruct((B, Cout, 1), jnp.float32)
    act_spec = pl.BlockSpec((1, tco, TL), lambda b, j: (b, j, 0))
    sum_spec = pl.BlockSpec((1, tco, 1), lambda b, j: (b, j, 0))
    out_shape = [act_out, sum_out, sum_out]
    out_specs = [act_spec, sum_spec, sum_spec]
    if do_res:
        out_shape += [act_out, sum_out, sum_out]
        out_specs += [act_spec, sum_spec, sum_spec]

    kernel = functools.partial(
        _stage_kernel, K=K, pad=pad, T=T, TL=TL,
        apply_input_bn_relu=apply_in, compute_residual=do_res, dw_dtype=dw_dtype)

    return pl.pallas_call(
        kernel,
        grid=(B, nco),
        in_specs=in_specs,
        out_specs=out_specs,
        out_shape=out_shape,
        scratch_shapes=[pltpu.VMEM((Cin, TL), MXU_DTYPE)],   # depthwise result, per b
        compiler_params=pltpu.CompilerParams(
            dimension_semantics=("parallel", "arbitrary"),
            vmem_limit_bytes=vmem_limit),
    )(*args)


def block_forward(x, params, *, cout_tile=256, eps=EPS):
    """QuartzNet Block: res = BN(1x1(x)); h = Conv(x); [ReLU; Conv]*(r-1); relu(h+res)."""
    B, Cin, T = x.shape
    stages = params["stages"]
    K = stages[0]["w_dw"].shape[1]
    pad = (K - 1) // 2
    TL = _round_up(T + 2 * pad, LANE)
    Cout = stages[-1]["w_pw"].shape[0]
    n = B * T
    vmem_limit, dw_dtype = _tpu_config()

    # One-time layout transform: valid time at lanes [0, T); the zero tail
    # [T, TL) (circularly) provides both left and right "same" padding.
    a = jnp.pad(x, ((0, 0), (0, 0), (0, TL - T))).astype(ACT_DTYPE)

    # Stage 0 + fused residual-branch pointwise conv.
    st0 = stages[0]
    y, s, ss, res_pre, rs, rss = _stage_call(
        a, st0["w_dw"], st0["w_pw"], T=T, pad=pad, cout_tile=cout_tile,
        vmem_limit=vmem_limit, dw_dtype=dw_dtype, w_res=params["res_w"])
    affine = _stats_to_affine(s, ss, st0["gamma"], st0["beta"], n, eps)
    res_affine = _stats_to_affine(
        rs, rss, params["res_gamma"], params["res_beta"], n, eps)

    # Remaining stages: previous BN affine + ReLU fused into each stage's kernel.
    for st in stages[1:]:
        y, s, ss = _stage_call(
            y, st["w_dw"], st["w_pw"], T=T, pad=pad, cout_tile=cout_tile,
            vmem_limit=vmem_limit, dw_dtype=dw_dtype, in_affine=affine)
        affine = _stats_to_affine(s, ss, st["gamma"], st["beta"], n, eps)

    # Finalize: last stage BN + residual BN + add + ReLU, sliced to (B, C, T).
    return pl.pallas_call(
        functools.partial(_finalize_kernel, T=T),
        grid=(B,),
        in_specs=[
            pl.BlockSpec((1, Cout, TL), lambda b: (b, 0, 0)),
            pl.BlockSpec((1, Cout, TL), lambda b: (b, 0, 0)),
            pl.BlockSpec((2, Cout, 1), lambda b: (0, 0, 0)),
            pl.BlockSpec((2, Cout, 1), lambda b: (0, 0, 0)),
        ],
        out_specs=pl.BlockSpec((1, Cout, T), lambda b: (b, 0, 0)),
        out_shape=jax.ShapeDtypeStruct((B, Cout, T), jnp.float32),
        compiler_params=pltpu.CompilerParams(
            dimension_semantics=("parallel",),
            vmem_limit_bytes=vmem_limit),
    )(y, res_pre, affine, res_affine)


# ----------------------------- pure-JAX reference -----------------------------

def _ref_bn(y, gamma, beta, eps=EPS):
    mean = y.mean(axis=(0, 2), keepdims=True)
    var = ((y - mean) ** 2).mean(axis=(0, 2), keepdims=True)
    return (y - mean) / jnp.sqrt(var + eps) * gamma[None, :, None] + beta[None, :, None]


def _ref_conv(x, w_dw, w_pw, gamma, beta):
    K = w_dw.shape[1]
    pad = (K - 1) // 2
    y = jax.lax.conv_general_dilated(
        x, w_dw[:, None, :], (1,), [(pad, pad)],
        dimension_numbers=("NCH", "OIH", "NCH"),
        feature_group_count=x.shape[1])
    y = jnp.einsum("oc,bct->bot", w_pw, y)
    return _ref_bn(y, gamma, beta)


def ref_block(x, params):
    res = _ref_bn(jnp.einsum("oc,bct->bot", params["res_w"], x),
                  params["res_gamma"], params["res_beta"])
    h = x
    for i, st in enumerate(params["stages"]):
        if i > 0:
            h = jnp.maximum(h, 0.0)
        h = _ref_conv(h, st["w_dw"], st["w_pw"], st["gamma"], st["beta"])
    return jnp.maximum(h + res, 0.0)


# ----------------------------- deterministic init -----------------------------

def init_params(key, r, c_in, c_out, K):
    stages = []
    cin = c_in
    for _ in range(r):
        key, k1, k2, k3, k4 = jax.random.split(key, 5)
        stages.append(dict(
            w_dw=0.3 * jax.random.normal(k1, (cin, K), jnp.float32),
            w_pw=(1.0 / jnp.sqrt(cin)) * jax.random.normal(k2, (c_out, cin), jnp.float32),
            gamma=1.0 + 0.1 * jax.random.normal(k3, (c_out,), jnp.float32),
            beta=0.1 * jax.random.normal(k4, (c_out,), jnp.float32),
        ))
        cin = c_out
    key, k1, k2, k3 = jax.random.split(key, 4)
    return dict(
        stages=stages,
        res_w=(1.0 / jnp.sqrt(c_in)) * jax.random.normal(k1, (c_out, c_in), jnp.float32),
        res_gamma=1.0 + 0.1 * jax.random.normal(k2, (c_out,), jnp.float32),
        res_beta=0.1 * jax.random.normal(k3, (c_out,), jnp.float32),
    )


if __name__ == "__main__":
    # Small shapes consistent with Block(r, in_channels, out_channels, kernel_size).
    B, C_IN, C_OUT, T, K, R = 2, 8, 32, 16, 5, 3

    key = jax.random.PRNGKey(0)
    key, kx = jax.random.split(key)
    x = jax.random.normal(kx, (B, C_IN, T), jnp.float32)
    params = init_params(key, R, C_IN, C_OUT, K)

    # cout_tile=16 exercises the Cout-tiled grid axis even at these tiny shapes.
    fwd = jax.jit(functools.partial(block_forward, cout_tile=16))
    out = jax.block_until_ready(fwd(x, params))
    assert out.shape == (B, C_OUT, T)

    ref = ref_block(x, params)
    err = float(jnp.max(jnp.abs(out - ref)))
    # bf16 activation storage + bf16 MXU operands -> looser tolerance than pure f32.
    if not jnp.allclose(out, ref, rtol=4e-2, atol=5e-2):
        raise AssertionError(f"mismatch vs reference: max abs err = {err}")

    print("KERNEL_OK")
</pallas_src>

<mosaic_0001>
module attributes {stable_mosaic.version = 11 : i64} {
  func.func @_stage_kernel(%arg0: i32, %arg1: i32, %arg2: memref<1x8x128xbf16, #tpu.memory_space<vmem>>, %arg3: memref<5x8x1xf32, #tpu.memory_space<vmem>>, %arg4: memref<16x8xbf16, #tpu.memory_space<vmem>>, %arg5: memref<16x8xbf16, #tpu.memory_space<vmem>>, %arg6: memref<1x16x128xbf16, #tpu.memory_space<vmem>>, %arg7: memref<1x16x1xf32, #tpu.memory_space<vmem>>, %arg8: memref<1x16x1xf32, #tpu.memory_space<vmem>>, %arg9: memref<1x16x128xbf16, #tpu.memory_space<vmem>>, %arg10: memref<1x16x1xf32, #tpu.memory_space<vmem>>, %arg11: memref<1x16x1xf32, #tpu.memory_space<vmem>>, %arg12: memref<8x128xbf16, #tpu.memory_space<vmem>>) attributes {dimension_semantics = [#tpu.dimension_semantics<parallel>, #tpu.dimension_semantics<arbitrary>], iteration_bounds = array<i64: 2, 2>, scalar_prefetch = 0 : i64, scratch_operands = 1 : i64, tpu.core_type = #tpu.core_type<tc>, window_params = [{transform_indices = @transform_0, window_bounds = array<i64: 1, 8, 128>}, {pipeline_mode = #tpu.pipeline_mode<synchronous>, transform_indices = @transform_1, window_bounds = array<i64: 5, 8, 1>}, {transform_indices = @transform_2, window_bounds = array<i64: 16, 8>}, {transform_indices = @transform_3, window_bounds = array<i64: 16, 8>}, {transform_indices = @transform_4, window_bounds = array<i64: 1, 16, 128>}, {transform_indices = @transform_5, window_bounds = array<i64: 1, 16, 1>}, {transform_indices = @transform_6, window_bounds = array<i64: 1, 16, 1>}, {transform_indices = @transform_7, window_bounds = array<i64: 1, 16, 128>}, {transform_indices = @transform_8, window_bounds = array<i64: 1, 16, 1>}, {transform_indices = @transform_9, window_bounds = array<i64: 1, 16, 1>}]} {
    %0 = tpu.iota {dimensions = array<i32: 1>} : vector<1x128xi32>
    %c16_i32 = arith.constant 16 : i32
    %1 = vector.broadcast %c16_i32 : i32 to vector<1x128xi32>
    %2 = arith.cmpi slt, %0, %1 : vector<1x128xi32>
    %3 = arith.extui %2 : vector<1x128xi1> to vector<1x128xi32>
    %4 = arith.sitofp %3 : vector<1x128xi32> to vector<1x128xf32>
    %c0_i32 = arith.constant 0 : i32
    %5 = arith.cmpi eq, %arg1, %c0_i32 : i32
    %6 = arith.extui %5 : i1 to i32
    %c0_i32_0 = arith.constant 0 : i32
    %7 = arith.cmpi ne, %6, %c0_i32_0 : i32
    scf.if %7 {
      %c0_32 = arith.constant 0 : index
      %c0_33 = arith.constant 0 : index
      %c0_34 = arith.constant 0 : index
      %49 = vector.load %arg2[%c0_32, %c0_33, %c0_34] : memref<1x8x128xbf16, #tpu.memory_space<vmem>>, vector<1x8x128xbf16>
      %50 = vector.shape_cast %49 : vector<1x8x128xbf16> to vector<8x128xbf16>
      %51 = arith.extf %50 : vector<8x128xbf16> to vector<8x128xf32>
      %c2 = arith.constant 2 : index
      %c0_35 = arith.constant 0 : index
      %c0_36 = arith.constant 0 : index
      %52 = vector.load %arg3[%c2, %c0_35, %c0_36] : memref<5x8x1xf32, #tpu.memory_space<vmem>>, vector<1x8x1xf32>
      %53 = vector.shape_cast %52 : vector<1x8x1xf32> to vector<8x1xf32>
      %54 = vector.broadcast %53 : vector<8x1xf32> to vector<8x128xf32>
      %55 = arith.mulf %51, %54 : vector<8x128xf32>
      %c2_i32 = arith.constant 2 : i32
      %56 = tpu.dynamic_rotate %51 by %c2_i32 dim 1 : vector<8x128xf32>, i32 -> vector<8x128xf32>
      %c0_37 = arith.constant 0 : index
      %c0_38 = arith.constant 0 : index
      %c0_39 = arith.constant 0 : index
      %57 = vector.load %arg3[%c0_37, %c0_38, %c0_39] : memref<5x8x1xf32, #tpu.memory_space<vmem>>, vector<1x8x1xf32>
      %58 = vector.shape_cast %57 : vector<1x8x1xf32> to vector<8x1xf32>
      %59 = vector.broadcast %58 : vector<8x1xf32> to vector<8x128xf32>
      %60 = arith.mulf %56, %59 : vector<8x128xf32>
      %61 = arith.addf %55, %60 : vector<8x128xf32>
      %c1_i32 = arith.constant 1 : i32
      %62 = tpu.dynamic_rotate %51 by %c1_i32 dim 1 : vector<8x128xf32>, i32 -> vector<8x128xf32>
      %c1 = arith.constant 1 : index
      %c0_40 = arith.constant 0 : index
      %c0_41 = arith.constant 0 : index
      %63 = vector.load %arg3[%c1, %c0_40, %c0_41] : memref<5x8x1xf32, #tpu.memory_space<vmem>>, vector<1x8x1xf32>
      %64 = vector.shape_cast %63 : vector<1x8x1xf32> to vector<8x1xf32>
      %65 = vector.broadcast %64 : vector<8x1xf32> to vector<8x128xf32>
      %66 = arith.mulf %62, %65 : vector<8x128xf32>
      %67 = arith.addf %61, %66 : vector<8x128xf32>
      %c127_i32 = arith.constant 127 : i32
      %68 = tpu.dynamic_rotate %51 by %c127_i32 dim 1 : vector<8x128xf32>, i32 -> vector<8x128xf32>
      %c3 = arith.constant 3 : index
      %c0_42 = arith.constant 0 : index
      %c0_43 = arith.constant 0 : index
      %69 = vector.load %arg3[%c3, %c0_42, %c0_43] : memref<5x8x1xf32, #tpu.memory_space<vmem>>, vector<1x8x1xf32>
      %70 = vector.shape_cast %69 : vector<1x8x1xf32> to vector<8x1xf32>
      %71 = vector.broadcast %70 : vector<8x1xf32> to vector<8x128xf32>
      %72 = arith.mulf %68, %71 : vector<8x128xf32>
      %73 = arith.addf %67, %72 : vector<8x128xf32>
      %c126_i32 = arith.constant 126 : i32
      %74 = tpu.dynamic_rotate %51 by %c126_i32 dim 1 : vector<8x128xf32>, i32 -> vector<8x128xf32>
      %c4 = arith.constant 4 : index
      %c0_44 = arith.constant 0 : index
      %c0_45 = arith.constant 0 : index
      %75 = vector.load %arg3[%c4, %c0_44, %c0_45] : memref<5x8x1xf32, #tpu.memory_space<vmem>>, vector<1x8x1xf32>
      %76 = vector.shape_cast %75 : vector<1x8x1xf32> to vector<8x1xf32>
      %77 = vector.broadcast %76 : vector<8x1xf32> to vector<8x128xf32>
      %78 = arith.mulf %74, %77 : vector<8x128xf32>
      %79 = arith.addf %73, %78 : vector<8x128xf32>
      %80 = arith.truncf %79 : vector<8x128xf32> to vector<8x128xbf16>
      %c0_46 = arith.constant 0 : index
      %c0_47 = arith.constant 0 : index
      %81 = vector.load %arg12[%c0_46, %c0_47] : memref<8x128xbf16, #tpu.memory_space<vmem>>, vector<8x128xbf16>
      tpu.vector_store %arg12[%c0_46, %c0_47], %80 {strides = array<i32>} : memref<8x128xbf16, #tpu.memory_space<vmem>>, vector<8x128xbf16>,
    } else {
    }
    %c0 = arith.constant 0 : index
    %c0_1 = arith.constant 0 : index
    %8 = vector.load %arg4[%c0, %c0_1] : memref<16x8xbf16, #tpu.memory_space<vmem>>, vector<16x8xbf16>
    %c0_2 = arith.constant 0 : index
    %c0_3 = arith.constant 0 : index
    %9 = vector.load %arg12[%c0_2, %c0_3] : memref<8x128xbf16, #tpu.memory_space<vmem>>, vector<8x128xbf16>
    %cst = arith.constant dense<0.000000e+00> : vector<16x128xf32>
    %10 = tpu.matmul %8, %9, %cst {dimension_numbers = #tpu.dot_dimension_numbers<[1], [0], [0], [1], [0, 0, 1, 1], [], []>} : vector<16x8xbf16>, vector<8x128xbf16>, vector<16x128xf32> -> vector<16x128xf32>
    %11 = vector.broadcast %4 : vector<1x128xf32> to vector<16x128xf32>
    %12 = arith.mulf %10, %11 : vector<16x128xf32>
    %13 = arith.truncf %10 : vector<16x128xf32> to vector<16x128xbf16>
    %c0_4 = arith.constant 0 : index
    %c0_5 = arith.constant 0 : index
    %c0_6 = arith.constant 0 : index
    %14 = vector.load %arg6[%c0_4, %c0_5, %c0_6] : memref<1x16x128xbf16, #tpu.memory_space<vmem>>, vector<1x16x128xbf16>
    %15 = vector.shape_cast %14 : vector<1x16x128xbf16> to vector<16x128xbf16>
    %16 = vector.shape_cast %13 : vector<16x128xbf16> to vector<1x16x128xbf16>
    tpu.vector_store %arg6[%c0_4, %c0_5, %c0_6], %16 {strides = array<i32>} : memref<1x16x128xbf16, #tpu.memory_space<vmem>>, vector<1x16x128xbf16>,
    %cst_7 = arith.constant dense<0.000000e+00> : vector<16xf32>
    %17 = vector.multi_reduction <add>, %12, %cst_7 [1] : vector<16x128xf32> to vector<16xf32>
    %18 = vector.shape_cast %17 : vector<16xf32> to vector<16x1xf32>
    %c0_8 = arith.constant 0 : index
    %c0_9 = arith.constant 0 : index
    %c0_10 = arith.constant 0 : index
    %19 = vector.load %arg7[%c0_8, %c0_9, %c0_10] : memref<1x16x1xf32, #tpu.memory_space<vmem>>, vector<1x16x1xf32>
    %20 = vector.shape_cast %19 : vector<1x16x1xf32> to vector<16x1xf32>
    %21 = vector.shape_cast %18 : vector<16x1xf32> to vector<1x16x1xf32>
    tpu.vector_store %arg7[%c0_8, %c0_9, %c0_10], %21 {strides = array<i32>} : memref<1x16x1xf32, #tpu.memory_space<vmem>>, vector<1x16x1xf32>,
    %22 = arith.mulf %12, %12 : vector<16x128xf32>
    %cst_11 = arith.constant dense<0.000000e+00> : vector<16xf32>
    %23 = vector.multi_reduction <add>, %22, %cst_11 [1] : vector<16x128xf32> to vector<16xf32>
    %24 = vector.shape_cast %23 : vector<16xf32> to vector<16x1xf32>
    %c0_12 = arith.constant 0 : index
    %c0_13 = arith.constant 0 : index
    %c0_14 = arith.constant 0 : index
    %25 = vector.load %arg8[%c0_12, %c0_13, %c0_14] : memref<1x16x1xf32, #tpu.memory_space<vmem>>, vector<1x16x1xf32>
    %26 = vector.shape_cast %25 : vector<1x16x1xf32> to vector<16x1xf32>
    %27 = vector.shape_cast %24 : vector<16x1xf32> to vector<1x16x1xf32>
    tpu.vector_store %arg8[%c0_12, %c0_13, %c0_14], %27 {strides = array<i32>} : memref<1x16x1xf32, #tpu.memory_space<vmem>>, vector<1x16x1xf32>,
    %c0_15 = arith.constant 0 : index
    %c0_16 = arith.constant 0 : index
    %28 = vector.load %arg5[%c0_15, %c0_16] : memref<16x8xbf16, #tpu.memory_space<vmem>>, vector<16x8xbf16>
    %c0_17 = arith.constant 0 : index
    %c0_18 = arith.constant 0 : index
    %c0_19 = arith.constant 0 : index
    %29 = vector.load %arg2[%c0_17, %c0_18, %c0_19] : memref<1x8x128xbf16, #tpu.memory_space<vmem>>, vector<1x8x128xbf16>
    %30 = vector.shape_cast %29 : vector<1x8x128xbf16> to vector<8x128xbf16>
    %cst_20 = arith.constant dense<0.000000e+00> : vector<16x128xf32>
    %31 = tpu.matmul %28, %30, %cst_20 {dimension_numbers = #tpu.dot_dimension_numbers<[1], [0], [0], [1], [0, 0, 1, 1], [], []>} : vector<16x8xbf16>, vector<8x128xbf16>, vector<16x128xf32> -> vector<16x128xf32>
    %32 = vector.broadcast %4 : vector<1x128xf32> to vector<16x128xf32>
    %33 = arith.mulf %31, %32 : vector<16x128xf32>
    %34 = arith.truncf %31 : vector<16x128xf32> to vector<16x128xbf16>
    %c0_21 = arith.constant 0 : index
    %c0_22 = arith.constant 0 : index
    %c0_23 = arith.constant 0 : index
    %35 = vector.load %arg9[%c0_21, %c0_22, %c0_23] : memref<1x16x128xbf16, #tpu.memory_space<vmem>>, vector<1x16x128xbf16>
    %36 = vector.shape_cast %35 : vector<1x16x128xbf16> to vector<16x128xbf16>
    %37 = vector.shape_cast %34 : vector<16x128xbf16> to vector<1x16x128xbf16>
    tpu.vector_store %arg9[%c0_21, %c0_22, %c0_23], %37 {strides = array<i32>} : memref<1x16x128xbf16, #tpu.memory_space<vmem>>, vector<1x16x128xbf16>,
    %cst_24 = arith.constant dense<0.000000e+00> : vector<16xf32>
    %38 = vector.multi_reduction <add>, %33, %cst_24 [1] : vector<16x128xf32> to vector<16xf32>
    %39 = vector.shape_cast %38 : vector<16xf32> to vector<16x1xf32>
    %c0_25 = arith.constant 0 : index
    %c0_26 = arith.constant 0 : index
    %c0_27 = arith.constant 0 : index
    %40 = vector.load %arg10[%c0_25, %c0_26, %c0_27] : memref<1x16x1xf32, #tpu.memory_space<vmem>>, vector<1x16x1xf32>
    %41 = vector.shape_cast %40 : vector<1x16x1xf32> to vector<16x1xf32>
    %42 = vector.shape_cast %39 : vector<16x1xf32> to vector<1x16x1xf32>
    tpu.vector_store %arg10[%c0_25, %c0_26, %c0_27], %42 {strides = array<i32>} : memref<1x16x1xf32, #tpu.memory_space<vmem>>, vector<1x16x1xf32>,
    %43 = arith.mulf %33, %33 : vector<16x128xf32>
    %cst_28 = arith.constant dense<0.000000e+00> : vector<16xf32>
    %44 = vector.multi_reduction <add>, %43, %cst_28 [1] : vector<16x128xf32> to vector<16xf32>
    %45 = vector.shape_cast %44 : vector<16xf32> to vector<16x1xf32>
    %c0_29 = arith.constant 0 : index
    %c0_30 = arith.constant 0 : index
    %c0_31 = arith.constant 0 : index
    %46 = vector.load %arg11[%c0_29, %c0_30, %c0_31] : memref<1x16x1xf32, #tpu.memory_space<vmem>>, vector<1x16x1xf32>
    %47 = vector.shape_cast %46 : vector<1x16x1xf32> to vector<16x1xf32>
    %48 = vector.shape_cast %45 : vector<16x1xf32> to vector<1x16x1xf32>
    tpu.vector_store %arg11[%c0_29, %c0_30, %c0_31], %48 {strides = array<i32>} : memref<1x16x1xf32, #tpu.memory_space<vmem>>, vector<1x16x1xf32>,
    return
  }
  func.func @transform_0(%arg0: i32, %arg1: i32) -> (i32, i32, i32) {
    %c0_i32 = arith.constant 0 : i32
    %c0_i32_0 = arith.constant 0 : i32
    %c0_i32_1 = arith.constant 0 : i32
    return %arg0, %c0_i32, %c0_i32_0 : i32, i32, i32
  }
  func.func @transform_1(%arg0: i32, %arg1: i32) -> (i32, i32, i32) {
    %c0_i32 = arith.constant 0 : i32
    %c0_i32_0 = arith.constant 0 : i32
    %c0_i32_1 = arith.constant 0 : i32
    %c0_i32_2 = arith.constant 0 : i32
    return %c0_i32, %c0_i32_0, %c0_i32_1 : i32, i32, i32
  }
  func.func @transform_2(%arg0: i32, %arg1: i32) -> (i32, i32) {
    %c0_i32 = arith.constant 0 : i32
    %c0_i32_0 = arith.constant 0 : i32
    return %arg1, %c0_i32 : i32, i32
  }
  func.func @transform_3(%arg0: i32, %arg1: i32) -> (i32, i32) {
    %c0_i32 = arith.constant 0 : i32
    %c0_i32_0 = arith.constant 0 : i32
    return %arg1, %c0_i32 : i32, i32
  }
  func.func @transform_4(%arg0: i32, %arg1: i32) -> (i32, i32, i32) {
    %c0_i32 = arith.constant 0 : i32
    %c0_i32_0 = arith.constant 0 : i32
    return %arg0, %arg1, %c0_i32 : i32, i32, i32
  }
  func.func @transform_5(%arg0: i32, %arg1: i32) -> (i32, i32, i32) {
    %c0_i32 = arith.constant 0 : i32
    %c0_i32_0 = arith.constant 0 : i32
    return %arg0, %arg1, %c0_i32 : i32, i32, i32
  }
  func.func @transform_6(%arg0: i32, %arg1: i32) -> (i32, i32, i32) {
    %c0_i32 = arith.constant 0 : i32
    %c0_i32_0 = arith.constant 0 : i32
    return %arg0, %arg1, %c0_i32 : i32, i32, i32
  }
  func.func @transform_7(%arg0: i32, %arg1: i32) -> (i32, i32, i32) {
    %c0_i32 = arith.constant 0 : i32
    %c0_i32_0 = arith.constant 0 : i32
    return %arg0, %arg1, %c0_i32 : i32, i32, i32
  }
  func.func @transform_8(%arg0: i32, %arg1: i32) -> (i32, i32, i32) {
    %c0_i32 = arith.constant 0 : i32
    %c0_i32_0 = arith.constant 0 : i32
    return %arg0, %arg1, %c0_i32 : i32, i32, i32
  }
  func.func @transform_9(%arg0: i32, %arg1: i32) -> (i32, i32, i32) {
    %c0_i32 = arith.constant 0 : i32
    %c0_i32_0 = arith.constant 0 : i32
    return %arg0, %arg1, %c0_i32 : i32, i32, i32
  }
}

module attributes {stable_mosaic.version = 11 : i64} {
  func.func @_stage_kernel(%arg0: i32, %arg1: i32, %arg2: memref<1x32x128xbf16, #tpu.memory_space<vmem>>, %arg3: memref<5x32x1xf32, #tpu.memory_space<vmem>>, %arg4: memref<16x32xbf16, #tpu.memory_space<vmem>>, %arg5: memref<2x32x1xf32, #tpu.memory_space<vmem>>, %arg6: memref<1x16x128xbf16, #tpu.memory_space<vmem>>, %arg7: memref<1x16x1xf32, #tpu.memory_space<vmem>>, %arg8: memref<1x16x1xf32, #tpu.memory_space<vmem>>, %arg9: memref<32x128xbf16, #tpu.memory_space<vmem>>) attributes {dimension_semantics = [#tpu.dimension_semantics<parallel>, #tpu.dimension_semantics<arbitrary>], iteration_bounds = array<i64: 2, 2>, scalar_prefetch = 0 : i64, scratch_operands = 1 : i64, tpu.core_type = #tpu.core_type<tc>, window_params = [{transform_indices = @transform_0, window_bounds = array<i64: 1, 32, 128>}, {pipeline_mode = #tpu.pipeline_mode<synchronous>, transform_indices = @transform_1, window_bounds = array<i64: 5, 32, 1>}, {transform_indices = @transform_2, window_bounds = array<i64: 16, 32>}, {pipeline_mode = #tpu.pipeline_mode<synchronous>, transform_indices = @transform_3, window_bounds = array<i64: 2, 32, 1>}, {transform_indices = @transform_4, window_bounds = array<i64: 1, 16, 128>}, {transform_indices = @transform_5, window_bounds = array<i64: 1, 16, 1>}, {transform_indices = @transform_6, window_bounds = array<i64: 1, 16, 1>}]} {
    %0 = tpu.iota {dimensions = array<i32: 1>} : vector<1x128xi32>
    %c16_i32 = arith.constant 16 : i32
    %1 = vector.broadcast %c16_i32 : i32 to vector<1x128xi32>
    %2 = arith.cmpi slt, %0, %1 : vector<1x128xi32>
    %3 = arith.extui %2 : vector<1x128xi1> to vector<1x128xi32>
    %4 = arith.sitofp %3 : vector<1x128xi32> to vector<1x128xf32>
    %c0_i32 = arith.constant 0 : i32
    %5 = arith.cmpi eq, %arg1, %c0_i32 : i32
    %6 = arith.extui %5 : i1 to i32
    %c0_i32_0 = arith.constant 0 : i32
    %7 = arith.cmpi ne, %6, %c0_i32_0 : i32
    scf.if %7 {
      %c0_15 = arith.constant 0 : index
      %c0_16 = arith.constant 0 : index
      %c0_17 = arith.constant 0 : index
      %28 = vector.load %arg2[%c0_15, %c0_16, %c0_17] : memref<1x32x128xbf16, #tpu.memory_space<vmem>>, vector<1x32x128xbf16>
      %29 = vector.shape_cast %28 : vector<1x32x128xbf16> to vector<32x128xbf16>
      %30 = arith.extf %29 : vector<32x128xbf16> to vector<32x128xf32>
      %c0_18 = arith.constant 0 : index
      %c0_19 = arith.constant 0 : index
      %c0_20 = arith.constant 0 : index
      %31 = vector.load %arg5[%c0_18, %c0_19, %c0_20] : memref<2x32x1xf32, #tpu.memory_space<vmem>>, vector<1x32x1xf32>
      %32 = vector.shape_cast %31 : vector<1x32x1xf32> to vector<32x1xf32>
      %33 = vector.broadcast %32 : vector<32x1xf32> to vector<32x128xf32>
      %34 = arith.mulf %30, %33 : vector<32x128xf32>
      %c1 = arith.constant 1 : index
      %c0_21 = arith.constant 0 : index
      %c0_22 = arith.constant 0 : index
      %35 = vector.load %arg5[%c1, %c0_21, %c0_22] : memref<2x32x1xf32, #tpu.memory_space<vmem>>, vector<1x32x1xf32>
      %36 = vector.shape_cast %35 : vector<1x32x1xf32> to vector<32x1xf32>
      %37 = vector.broadcast %36 : vector<32x1xf32> to vector<32x128xf32>
      %38 = arith.addf %34, %37 : vector<32x128xf32>
      %cst_23 = arith.constant 0.000000e+00 : f32
      %39 = vector.broadcast %cst_23 : f32 to vector<32x128xf32>
      %40 = arith.maximumf %38, %39 : vector<32x128xf32>
      %41 = vector.broadcast %4 : vector<1x128xf32> to vector<32x128xf32>
      %42 = arith.mulf %40, %41 : vector<32x128xf32>
      %c2 = arith.constant 2 : index
      %c0_24 = arith.constant 0 : index
      %c0_25 = arith.constant 0 : index
      %43 = vector.load %arg3[%c2, %c0_24, %c0_25] : memref<5x32x1xf32, #tpu.memory_space<vmem>>, vector<1x32x1xf32>
      %44 = vector.shape_cast %43 : vector<1x32x1xf32> to vector<32x1xf32>
      %45 = vector.broadcast %44 : vector<32x1xf32> to vector<32x128xf32>
      %46 = arith.mulf %42, %45 : vector<32x128xf32>
      %c2_i32 = arith.constant 2 : i32
      %47 = tpu.dynamic_rotate %42 by %c2_i32 dim 1 : vector<32x128xf32>, i32 -> vector<32x128xf32>
      %c0_26 = arith.constant 0 : index
      %c0_27 = arith.constant 0 : index
      %c0_28 = arith.constant 0 : index
      %48 = vector.load %arg3[%c0_26, %c0_27, %c0_28] : memref<5x32x1xf32, #tpu.memory_space<vmem>>, vector<1x32x1xf32>
      %49 = vector.shape_cast %48 : vector<1x32x1xf32> to vector<32x1xf32>
      %50 = vector.broadcast %49 : vector<32x1xf32> to vector<32x128xf32>
      %51 = arith.mulf %47, %50 : vector<32x128xf32>
      %52 = arith.addf %46, %51 : vector<32x128xf32>
      %c1_i32 = arith.constant 1 : i32
      %53 = tpu.dynamic_rotate %42 by %c1_i32 dim 1 : vector<32x128xf32>, i32 -> vector<32x128xf32>
      %c1_29 = arith.constant 1 : index
      %c0_30 = arith.constant 0 : index
      %c0_31 = arith.constant 0 : index
      %54 = vector.load %arg3[%c1_29, %c0_30, %c0_31] : memref<5x32x1xf32, #tpu.memory_space<vmem>>, vector<1x32x1xf32>
      %55 = vector.shape_cast %54 : vector<1x32x1xf32> to vector<32x1xf32>
      %56 = vector.broadcast %55 : vector<32x1xf32> to vector<32x128xf32>
      %57 = arith.mulf %53, %56 : vector<32x128xf32>
      %58 = arith.addf %52, %57 : vector<32x128xf32>
      %c127_i32 = arith.constant 127 : i32
      %59 = tpu.dynamic_rotate %42 by %c127_i32 dim 1 : vector<32x128xf32>, i32 -> vector<32x128xf32>
      %c3 = arith.constant 3 : index
      %c0_32 = arith.constant 0 : index
      %c0_33 = arith.constant 0 : index
      %60 = vector.load %arg3[%c3, %c0_32, %c0_33] : memref<5x32x1xf32, #tpu.memory_space<vmem>>, vector<1x32x1xf32>
      %61 = vector.shape_cast %60 : vector<1x32x1xf32> to vector<32x1xf32>
      %62 = vector.broadcast %61 : vector<32x1xf32> to vector<32x128xf32>
      %63 = arith.mulf %59, %62 : vector<32x128xf32>
      %64 = arith.addf %58, %63 : vector<32x128xf32>
      %c126_i32 = arith.constant 126 : i32
      %65 = tpu.dynamic_rotate %42 by %c126_i32 dim 1 : vector<32x128xf32>, i32 -> vector<32x128xf32>
      %c4 = arith.constant 4 : index
      %c0_34 = arith.constant 0 : index
      %c0_35 = arith.constant 0 : index
      %66 = vector.load %arg3[%c4, %c0_34, %c0_35] : memref<5x32x1xf32, #tpu.memory_space<vmem>>, vector<1x32x1xf32>
      %67 = vector.shape_cast %66 : vector<1x32x1xf32> to vector<32x1xf32>
      %68 = vector.broadcast %67 : vector<32x1xf32> to vector<32x128xf32>
      %69 = arith.mulf %65, %68 : vector<32x128xf32>
      %70 = arith.addf %64, %69 : vector<32x128xf32>
      %71 = arith.truncf %70 : vector<32x128xf32> to vector<32x128xbf16>
      %c0_36 = arith.constant 0 : index
      %c0_37 = arith.constant 0 : index
      %72 = vector.load %arg9[%c0_36, %c0_37] : memref<32x128xbf16, #tpu.memory_space<vmem>>, vector<32x128xbf16>
      tpu.vector_store %arg9[%c0_36, %c0_37], %71 {strides = array<i32>} : memref<32x128xbf16, #tpu.memory_space<vmem>>, vector<32x128xbf16>,
    } else {
    }
    %c0 = arith.constant 0 : index
    %c0_1 = arith.constant 0 : index
    %8 = vector.load %arg4[%c0, %c0_1] : memref<16x32xbf16, #tpu.memory_space<vmem>>, vector<16x32xbf16>
    %c0_2 = arith.constant 0 : index
    %c0_3 = arith.constant 0 : index
    %9 = vector.load %arg9[%c0_2, %c0_3] : memref<32x128xbf16, #tpu.memory_space<vmem>>, vector<32x128xbf16>
    %cst = arith.constant dense<0.000000e+00> : vector<16x128xf32>
    %10 = tpu.matmul %8, %9, %cst {dimension_numbers = #tpu.dot_dimension_numbers<[1], [0], [0], [1], [0, 0, 1, 1], [], []>} : vector<16x32xbf16>, vector<32x128xbf16>, vector<16x128xf32> -> vector<16x128xf32>
    %11 = vector.broadcast %4 : vector<1x128xf32> to vector<16x128xf32>
    %12 = arith.mulf %10, %11 : vector<16x128xf32>
    %13 = arith.truncf %10 : vector<16x128xf32> to vector<16x128xbf16>
    %c0_4 = arith.constant 0 : index
    %c0_5 = arith.constant 0 : index
    %c0_6 = arith.constant 0 : index
    %14 = vector.load %arg6[%c0_4, %c0_5, %c0_6] : memref<1x16x128xbf16, #tpu.memory_space<vmem>>, vector<1x16x128xbf16>
    %15 = vector.shape_cast %14 : vector<1x16x128xbf16> to vector<16x128xbf16>
    %16 = vector.shape_cast %13 : vector<16x128xbf16> to vector<1x16x128xbf16>
    tpu.vector_store %arg6[%c0_4, %c0_5, %c0_6], %16 {strides = array<i32>} : memref<1x16x128xbf16, #tpu.memory_space<vmem>>, vector<1x16x128xbf16>,
    %cst_7 = arith.constant dense<0.000000e+00> : vector<16xf32>
    %17 = vector.multi_reduction <add>, %12, %cst_7 [1] : vector<16x128xf32> to vector<16xf32>
    %18 = vector.shape_cast %17 : vector<16xf32> to vector<16x1xf32>
    %c0_8 = arith.constant 0 : index
    %c0_9 = arith.constant 0 : index
    %c0_10 = arith.constant 0 : index
    %19 = vector.load %arg7[%c0_8, %c0_9, %c0_10] : memref<1x16x1xf32, #tpu.memory_space<vmem>>, vector<1x16x1xf32>
    %20 = vector.shape_cast %19 : vector<1x16x1xf32> to vector<16x1xf32>
    %21 = vector.shape_cast %18 : vector<16x1xf32> to vector<1x16x1xf32>
    tpu.vector_store %arg7[%c0_8, %c0_9, %c0_10], %21 {strides = array<i32>} : memref<1x16x1xf32, #tpu.memory_space<vmem>>, vector<1x16x1xf32>,
    %22 = arith.mulf %12, %12 : vector<16x128xf32>
    %cst_11 = arith.constant dense<0.000000e+00> : vector<16xf32>
    %23 = vector.multi_reduction <add>, %22, %cst_11 [1] : vector<16x128xf32> to vector<16xf32>
    %24 = vector.shape_cast %23 : vector<16xf32> to vector<16x1xf32>
    %c0_12 = arith.constant 0 : index
    %c0_13 = arith.constant 0 : index
    %c0_14 = arith.constant 0 : index
    %25 = vector.load %arg8[%c0_12, %c0_13, %c0_14] : memref<1x16x1xf32, #tpu.memory_space<vmem>>, vector<1x16x1xf32>
    %26 = vector.shape_cast %25 : vector<1x16x1xf32> to vector<16x1xf32>
    %27 = vector.shape_cast %24 : vector<16x1xf32> to vector<1x16x1xf32>
    tpu.vector_store %arg8[%c0_12, %c0_13, %c0_14], %27 {strides = array<i32>} : memref<1x16x1xf32, #tpu.memory_space<vmem>>, vector<1x16x1xf32>,
    return
  }
  func.func @transform_0(%arg0: i32, %arg1: i32) -> (i32, i32, i32) {
    %c0_i32 = arith.constant 0 : i32
    %c0_i32_0 = arith.constant 0 : i32
    %c0_i32_1 = arith.constant 0 : i32
    return %arg0, %c0_i32, %c0_i32_0 : i32, i32, i32
  }
  func.func @transform_1(%arg0: i32, %arg1: i32) -> (i32, i32, i32) {
    %c0_i32 = arith.constant 0 : i32
    %c0_i32_0 = arith.constant 0 : i32
    %c0_i32_1 = arith.constant 0 : i32
    %c0_i32_2 = arith.constant 0 : i32
    return %c0_i32, %c0_i32_0, %c0_i32_1 : i32, i32, i32
  }
  func.func @transform_2(%arg0: i32, %arg1: i32) -> (i32, i32) {
    %c0_i32 = arith.constant 0 : i32
    %c0_i32_0 = arith.constant 0 : i32
    return %arg1, %c0_i32 : i32, i32
  }
  func.func @transform_3(%arg0: i32, %arg1: i32) -> (i32, i32, i32) {
    %c0_i32 = arith.constant 0 : i32
    %c0_i32_0 = arith.constant 0 : i32
    %c0_i32_1 = arith.constant 0 : i32
    %c0_i32_2 = arith.constant 0 : i32
    return %c0_i32, %c0_i32_0, %c0_i32_1 : i32, i32, i32
  }
  func.func @transform_4(%arg0: i32, %arg1: i32) -> (i32, i32, i32) {
    %c0_i32 = arith.constant 0 : i32
    %c0_i32_0 = arith.constant 0 : i32
    return %arg0, %arg1, %c0_i32 : i32, i32, i32
  }
  func.func @transform_5(%arg0: i32, %arg1: i32) -> (i32, i32, i32) {
    %c0_i32 = arith.constant 0 : i32
    %c0_i32_0 = arith.constant 0 : i32
    return %arg0, %arg1, %c0_i32 : i32, i32, i32
  }
  func.func @transform_6(%arg0: i32, %arg1: i32) -> (i32, i32, i32) {
    %c0_i32 = arith.constant 0 : i32
    %c0_i32_0 = arith.constant 0 : i32
    return %arg0, %arg1, %c0_i32 : i32, i32, i32
  }
}

module attributes {stable_mosaic.version = 11 : i64} {
  func.func @_finalize_kernel(%arg0: i32, %arg1: memref<1x32x128xbf16, #tpu.memory_space<vmem>>, %arg2: memref<1x32x128xbf16, #tpu.memory_space<vmem>>, %arg3: memref<2x32x1xf32, #tpu.memory_space<vmem>>, %arg4: memref<2x32x1xf32, #tpu.memory_space<vmem>>, %arg5: memref<1x32x16xf32, #tpu.memory_space<vmem>>) attributes {dimension_semantics = [#tpu.dimension_semantics<parallel>], iteration_bounds = array<i64: 2>, scalar_prefetch = 0 : i64, scratch_operands = 0 : i64, tpu.core_type = #tpu.core_type<tc>, window_params = [{transform_indices = @transform_0, window_bounds = array<i64: 1, 32, 128>}, {transform_indices = @transform_1, window_bounds = array<i64: 1, 32, 128>}, {pipeline_mode = #tpu.pipeline_mode<synchronous>, transform_indices = @transform_2, window_bounds = array<i64: 2, 32, 1>}, {pipeline_mode = #tpu.pipeline_mode<synchronous>, transform_indices = @transform_3, window_bounds = array<i64: 2, 32, 1>}, {transform_indices = @transform_4, window_bounds = array<i64: 1, 32, 16>}]} {
    %c0 = arith.constant 0 : index
    %c0_0 = arith.constant 0 : index
    %c0_1 = arith.constant 0 : index
    %0 = vector.load %arg1[%c0, %c0_0, %c0_1] : memref<1x32x128xbf16, #tpu.memory_space<vmem>>, vector<1x32x128xbf16>
    %1 = vector.shape_cast %0 : vector<1x32x128xbf16> to vector<32x128xbf16>
    %2 = arith.extf %1 : vector<32x128xbf16> to vector<32x128xf32>
    %c0_2 = arith.constant 0 : index
    %c0_3 = arith.constant 0 : index
    %c0_4 = arith.constant 0 : index
    %3 = vector.load %arg3[%c0_2, %c0_3, %c0_4] : memref<2x32x1xf32, #tpu.memory_space<vmem>>, vector<1x32x1xf32>
    %4 = vector.shape_cast %3 : vector<1x32x1xf32> to vector<32x1xf32>
    %5 = vector.broadcast %4 : vector<32x1xf32> to vector<32x128xf32>
    %6 = arith.mulf %2, %5 : vector<32x128xf32>
    %c1 = arith.constant 1 : index
    %c0_5 = arith.constant 0 : index
    %c0_6 = arith.constant 0 : index
    %7 = vector.load %arg3[%c1, %c0_5, %c0_6] : memref<2x32x1xf32, #tpu.memory_space<vmem>>, vector<1x32x1xf32>
    %8 = vector.shape_cast %7 : vector<1x32x1xf32> to vector<32x1xf32>
    %9 = vector.broadcast %8 : vector<32x1xf32> to vector<32x128xf32>
    %10 = arith.addf %6, %9 : vector<32x128xf32>
    %c0_7 = arith.constant 0 : index
    %c0_8 = arith.constant 0 : index
    %c0_9 = arith.constant 0 : index
    %11 = vector.load %arg2[%c0_7, %c0_8, %c0_9] : memref<1x32x128xbf16, #tpu.memory_space<vmem>>, vector<1x32x128xbf16>
    %12 = vector.shape_cast %11 : vector<1x32x128xbf16> to vector<32x128xbf16>
    %13 = arith.extf %12 : vector<32x128xbf16> to vector<32x128xf32>
    %c0_10 = arith.constant 0 : index
    %c0_11 = arith.constant 0 : index
    %c0_12 = arith.constant 0 : index
    %14 = vector.load %arg4[%c0_10, %c0_11, %c0_12] : memref<2x32x1xf32, #tpu.memory_space<vmem>>, vector<1x32x1xf32>
    %15 = vector.shape_cast %14 : vector<1x32x1xf32> to vector<32x1xf32>
    %16 = vector.broadcast %15 : vector<32x1xf32> to vector<32x128xf32>
    %17 = arith.mulf %13, %16 : vector<32x128xf32>
    %c1_13 = arith.constant 1 : index
    %c0_14 = arith.constant 0 : index
    %c0_15 = arith.constant 0 : index
    %18 = vector.load %arg4[%c1_13, %c0_14, %c0_15] : memref<2x32x1xf32, #tpu.memory_space<vmem>>, vector<1x32x1xf32>
    %19 = vector.shape_cast %18 : vector<1x32x1xf32> to vector<32x1xf32>
    %20 = vector.broadcast %19 : vector<32x1xf32> to vector<32x128xf32>
    %21 = arith.addf %17, %20 : vector<32x128xf32>
    %22 = arith.addf %10, %21 : vector<32x128xf32>
    %cst = arith.constant 0.000000e+00 : f32
    %23 = vector.broadcast %cst : f32 to vector<32x128xf32>
    %24 = arith.maximumf %22, %23 : vector<32x128xf32>
    %25 = vector.extract_strided_slice %24 {offsets = [0, 0], sizes = [32, 16], strides = [1, 1]} : vector<32x128xf32> to vector<32x16xf32>
    %c0_16 = arith.constant 0 : index
    %c0_17 = arith.constant 0 : index
    %c0_18 = arith.constant 0 : index
    %26 = vector.load %arg5[%c0_16, %c0_17, %c0_18] : memref<1x32x16xf32, #tpu.memory_space<vmem>>, vector<1x32x16xf32>
    %27 = vector.shape_cast %26 : vector<1x32x16xf32> to vector<32x16xf32>
    %28 = vector.shape_cast %25 : vector<32x16xf32> to vector<1x32x16xf32>
    tpu.vector_store %arg5[%c0_16, %c0_17, %c0_18], %28 {strides = array<i32>} : memref<1x32x16xf32, #tpu.memory_space<vmem>>, vector<1x32x16xf32>,
    return
  }
  func.func @transform_0(%arg0: i32) -> (i32, i32, i32) {
    %c0_i32 = arith.constant 0 : i32
    %c0_i32_0 = arith.constant 0 : i32
    %c0_i32_1 = arith.constant 0 : i32
    return %arg0, %c0_i32, %c0_i32_0 : i32, i32, i32
  }
  func.func @transform_1(%arg0: i32) -> (i32, i32, i32) {
    %c0_i32 = arith.constant 0 : i32
    %c0_i32_0 = arith.constant 0 : i32
    %c0_i32_1 = arith.constant 0 : i32
    return %arg0, %c0_i32, %c0_i32_0 : i32, i32, i32
  }
  func.func @transform_2(%arg0: i32) -> (i32, i32, i32) {
    %c0_i32 = arith.constant 0 : i32
    %c0_i32_0 = arith.constant 0 : i32
    %c0_i32_1 = arith.constant 0 : i32
    %c0_i32_2 = arith.constant 0 : i32
    return %c0_i32, %c0_i32_0, %c0_i32_1 : i32, i32, i32
  }
  func.func @transform_3(%arg0: i32) -> (i32, i32, i32) {
    %c0_i32 = arith.constant 0 : i32
    %c0_i32_0 = arith.constant 0 : i32
    %c0_i32_1 = arith.constant 0 : i32
    %c0_i32_2 = arith.constant 0 : i32
    return %c0_i32, %c0_i32_0, %c0_i32_1 : i32, i32, i32
  }
  func.func @transform_4(%arg0: i32) -> (i32, i32, i32) {
    %c0_i32 = arith.constant 0 : i32
    %c0_i32_0 = arith.constant 0 : i32
    %c0_i32_1 = arith.constant 0 : i32
    return %arg0, %c0_i32, %c0_i32_0 : i32, i32, i32
  }
}

</mosaic_0001>

<bundles_post_ra>
// kernel: block_forward.4
= control target key start
LH: loop header
LB: loop body
LE: loop exit
PB: predicated region body
PF: predicated region fallthrough
CT: control target
= control target key end

     0   :  { %s1323_s30 = smov 0   ;;  %s1325_s10 = smov 0   ;;  %s1465_s0 = inlined_call_operand.vmem [shape: bf16[2,8,128], index: 0, kind: input, shape index: {}]   ;;  %s1466_s1 = inlined_call_operand.vmem [shape: f32[5,8,1], index: 1, kind: input, shape index: {}]   ;;  %s1467_s2 = inlined_call_operand.vmem [shape: bf16[32,8], index: 2, kind: input, shape index: {}]   ;;  %s1468_s3 = inlined_call_operand.vmem [shape: bf16[32,8], index: 3, kind: input, shape index: {}]   ;;  %s1469_s4 = inlined_call_operand.vmem [shape: bf16[2,32,128], index: 4, kind: output, shape index: {0}]   ;;  %s1470_s5 = inlined_call_operand.vmem [shape: f32[2,32,1], index: 5, kind: output, shape index: {1}]   ;;  %s1471_s6 = inlined_call_operand.vmem [shape: f32[2,32,1], index: 6, kind: output, shape index: {2}]   ;;  %s1472_s7 = inlined_call_operand.vmem [shape: bf16[2,32,128], index: 7, kind: output, shape index: {3}]   ;;  %s1473_s8 = inlined_call_operand.vmem [shape: f32[2,32,1], index: 8, kind: output, shape index: {4}]   ;;  %s1474_s9 = inlined_call_operand.vmem [shape: f32[2,32,1], index: 9, kind: output, shape index: {5}]  }
   0x1   :  { %1476 = sst [smem:[#allocation6_spill]] %s1465_s0  ;;  %s1327_s11 = smov 0  }
   0x2   :  { %1477 = sst [smem:[#allocation7_spill]] %s1467_s2  ;;  %s1329_s12 = smov 0  }
   0x3   :  { %s1331_s13 = smov 0  }
   0x4 LB: > { %1478 = sst [smem:[#allocation3_spill]] %s1260_s12  ;;  %s29_s14 = sadd.s32 1, %s1256_s11  ;;  %s1264_s13 = sphi %s1331_s13, %s20_s13   ;;  %s1260_s12 = sphi %s1329_s12, %s1485_s12   ;;  %s1256_s11 = sphi %s1327_s11, %s1487_s11   ;;  %s1252_s10 = sphi %s1325_s10, %s1483_s10   ;;  %s1248_s30 = sphi %s1323_s30, %s1486_s30  }
   0x5   : > { %s32_s15 = sadd.s32 1, %s1260_s12  ;;  %p30_p0 = scmp.ge.s32.totalorder %s29_s14, 2 }
   0x6   : > { %p1105_p1 = scmp.ge.s32.totalorder %s1264_s13, 1  ;;  %p343_p2 = scmp.lt.s32.totalorder %s1264_s13, 5 }
   0x7   : > { %s1489_s14 = smov (%p30_p0, %s29_s14), 0  ;;  %s1491_s15 = smov (!%p30_p0, %s32_s15), %s1260_s12 }
   0x8   : > { %1479 = sst [smem:[#allocation4_spill]] %s1489_s14  ;;  %p344_p3 = pnand %p1105_p1, %p343_p2 }
   0x9   : > { %p34_p4 = scmp.ge.s32.totalorder %s1491_s15, 2  ;;  %p437_p5 = scmp.lt.s32.totalorder (!%p344_p3), %s1252_s10, 1 }
   0xa   : > { %347 = sbr.rel (%p344_p3) target bundleno = 536 (0x218), region = 36  ;;  %s1107_s16 = sshll.u32 (!%p344_p3), %s1248_s30, 1 }
   0xb   : > { %s1493_s15 = smov (%p34_p4, %s1491_s15), 0  ;;  %p442_p6 = scmp.lt.s32.totalorder (!%p344_p3), %s1107_s16, 3 }
   0xc   : > { %1480 = sst [smem:[#allocation5_spill]] %s1493_s15  ;;  %p1130_p7 = scmp.ne.s32.totalorder (!%p344_p3), %s1248_s30, 0 }
   0xd   : > { %s1481_s0 = sld [smem:[#allocation6_spill]] (!%p344_p3) }
   0xe   : > { %s1482_s2 = sld [smem:[#allocation7_spill]] (!%p344_p3) }
   0xf   : > { %v514_v0 = vlaneseq  ;;  %s1495_s10 = smov (!%p437_p5, %s1252_s10), 1  ;;  %s1497_s16 = smov (!%p442_p6, %s1107_s16), 3  ;;  %v1266_v2 = vmov 0.0  }
  0x10   : > { %s1106_s17 = sshll.u32 %s1495_s10, 2  ;;  %s1108_s21 = sshll.u32 %s1497_s16, 2 }
  0x11   : > { %v515_v1 = vand.u32 127, %v514_v0  ;;  %s1372_s27 = scalar_lea.vmem %s1468_s3, %s1108_s21  ;;  %s459_s28 = sadd.s32 %s1106_s17, %s1497_s16 }
  0x12   : > { %s1113_s29 = sshll.u32 %s459_s28, 2  ;;  %s1116_s10 = sshll.u32 %s459_s28, 3 }
  0x13   : > { %vm516_vm0 = vcmp.lt.s32.totalorder %v515_v1, 16  ;;  %s1359_s20 = scalar_lea.vmem %s1481_s0, %s1106_s17  ;;  %s1377_s0 = scalar_lea.vmem %s1469_s4, %s1113_s29 }
  0x14   : > { %v1362_v3 = vsel %vm516_vm0, 1.0, %v1266_v2  ;;  %s1367_s24 = scalar_lea.vmem %s1482_s2, %s1108_s21  ;;  %s1382_s12 = scalar_lea.vmem %s1470_s5, %s1116_s10 }
  0x15   : > { %s1387_s2 = scalar_lea.vmem %s1471_s6, %s1116_s10  ;;  %s1392_s16 = scalar_lea.vmem %s1472_s7, %s1113_s29 }
  0x16   : > { %s1397_s28 = scalar_lea.vmem %s1473_s8, %s1116_s10  ;;  %s1402_s14 = scalar_lea.vmem %s1474_s9, %s1116_s10 }
  0x17   : > { %522 = sbr.rel (%p1130_p7) target bundleno = 177 (0xb1), region = 40  ;;  %s1268_s18 = smov (!%p1130_p7), 2  }
  0x18   : > { %s1269_s19 = smov (!%p1130_p7), 127   ;;  %s1270_s15 = smov (!%p1130_p7), 1  }
  0x19   : > { %s1271_s22 = smov (!%p1130_p7), 126  }
  0x1c   : > { %v1132_v4 = vld [vmem:[%s1466_s1 + $0x8] sm:$0xff]  ;;  %v1131_v5 = vld [vmem:[%s1466_s1 + $0x10] sm:$0xff]  ;;  %v1267_v6 = vmov 0   ;;  %v1133_v7 = vld [vmem:[%s1466_s1 + $0x18] sm:$0xff] }
  0x1d   : > { %1223 = vset.pattern.permute.xlu1 %v1267_v6  ;;  %1222 = vset.pattern.permute.xlu0 %v1267_v6  ;;  %v535_v8 = vld [vmem:[%s1466_s1] sm:$0xff] }
  0x1e   : > { %549 = vperm.xlu1 %1223, %v1132_v4   ;;  %529 = vperm.xlu0 %1222, %v1131_v5   ;;  %v523_v9 = vld [vmem:[%s1359_s20] sm:$0xf] }
  0x1f   : > { %v524_v10 = vunpack.c.l.bf16 %v523_v9  ;;  %v1134_v11 = vld [vmem:[%s1466_s1 + $0x20] sm:$0xff] }
  0x22   : > { %560 = vperm.xlu1 %1223, %v1133_v7   ;;  %538 = vperm.xlu0 %1222, %v535_v8  }
  0x26   : > { %571 = vperm.xlu1 %1223, %v1134_v11   ;;  %533 = vrot.lane.b32.xlu0 %v524_v10, %s1268_s18 }
  0x2a   : > { %554 = vrot.lane.b32.xlu1 %v524_v10, %s1269_s19  ;;  %543 = vrot.lane.b32.xlu0 %v524_v10, %s1270_s15 }
  0x2e   : > { %565 = vrot.lane.b32.xlu0 %v524_v10, %s1271_s22 }
  0x99   : > { %v550_v12 = vpop.permute.xlu1 %549  ;;  %v530_v13 = vpop.permute.xlu0 %529 }
  0x9a   : > { %v532_v19 = vmul.f32 %v530_v13, %v524_v10 }
  0x9d   : > { %v561_v14 = vpop.permute.xlu1 %560  ;;  %v539_v15 = vpop.permute.xlu0 %538 }
  0xa1   : > { %v572_v16 = vpop.permute.xlu1 %571  ;;  %v534_v17 = vpop.permute.xlu0 %533 }
  0xa2   : > { %v541_v18 = vmul.f32 %v539_v15, %v534_v17 }
  0xa4   : > { %v542_v22 = vadd.f32 %v541_v18, %v532_v19 }
  0xa5   : > { %v555_v20 = vpop.permute.xlu1 %554  ;;  %v544_v21 = vpop.permute.xlu0 %543 }
  0xa6   : > { %v552_v23 = vmul.f32 %v550_v12, %v544_v21  ;;  %v563_v24 = vmul.f32 %v561_v14, %v555_v20 }
  0xa8   : > { %v553_v25 = vadd.f32 %v552_v23, %v542_v22 }
  0xa9   : > { %v566_v26 = vpop.permute.xlu0 %565 }
  0xaa   : > { %v564_v27 = vadd.f32 %v563_v24, %v553_v25  ;;  %v574_v28 = vmul.f32 %v572_v16, %v566_v26 }
  0xac   : > { %v575_v29 = vadd.f32 %v574_v28, %v564_v27 }
  0xae   : > { %v576_v30 = vpack.c.bf16 %v575_v29, %v575_v29 }
  0xb0   : > { %577 = vst [vmem:[#allocation2] sm:$0xf] %v576_v30 }
  0xb1 PF: > { %1163 = vmatprep.subr.bf16.mxu0 %v1266_v2  ;;  %1169 = vmatprep.subr.bf16.mxu1 %v1266_v2  ;;  %vm590_vm1 = vcmask 1043456   ;;  %v664_v32 = vld [vmem:[%s1359_s20] sm:$0xf]  ;;  %vm1272_vm2 = vmmov 0   ;;  %vm586_vm3 = vcmask 64512   ;;  %vm651_vm4 = vcmask 7168  }
  0xb2   : > { %v674_v34 = vsel %vm590_vm1, %v664_v32, 0  ;;  %1165 = vmatprep.mubr.msk.bf16.mxu0 %vm1272_vm2, %v1266_v2  ;;  %1171 = vmatprep.mubr.msk.bf16.mxu1 %vm1272_vm2, %v1266_v2  ;;  %v1224_v35 = vld [vmem:[%s1367_s24] sm:$0xff]  }
  0xb3   : > { %1170 = vmatpush3.bf16.msra.mxu1 %v674_v34  ;;  %v1225_v36 = vld [vmem:[%s1372_s27] sm:$0xff]  }
  0xb6   : > { %1172 = vmatmul.mubr.msk.bf16.vlgmr.msra.gmra.mxu1 %vm586_vm3, %v1225_v36 }
  0xb7   : > { %v580_v31 = vld [vmem:[#allocation2] sm:$0xf] }
  0xb8   : > { %v592_v33 = vsel %vm590_vm1, %v580_v31, 0 }
  0xb9   : > { %1164 = vmatpush3.bf16.msra.mxu0 %v592_v33 }
  0xbc   : > { %1166 = vmatmul.mubr.msk.bf16.vlgmr.msra.gmra.mxu0 %vm586_vm3, %v1224_v35 }
 0x176   : > { %v710_v38 = vpop.f32.mrf.mxu1 }
 0x177   : > { %v717_v47 = vmul.f32 %v1362_v3, %v710_v38 }
 0x178   : > { %v1173_v41 = vpop.f32.mrf.mxu1 }
 0x179   : > { %v735_v53 = vmul.f32 %v717_v47, %v717_v47 }
 0x17a   : > { %v713_v44 = vpop.f32.mrf.mxu1 }
 0x17b   : > { %v1157_v46 = vpack.c.bf16 %v713_v44, %v710_v38  ;;  %v718_v50 = vmul.f32 %v1362_v3, %v713_v44 }
 0x17c   : > { %v628_v37 = vpop.f32.mrf.mxu0  ;;  %v1174_v49 = vpop.f32.mrf.mxu1 }
 0x17d   : > { %v635_v39 = vmul.f32 %v1362_v3, %v628_v37  ;;  %1158 = vst [vmem:[%s1392_s16] sm:$0xff] %v1157_v46   ;;  %v736_v54 = vmul.f32 %v718_v50, %v718_v50 }
 0x17e   : > { %v1167_v40 = vpop.f32.mrf.mxu0 }
 0x17f   : > { %647 = vadd.xlane.f32.xlu0 %v635_v39  ;;  %v654_v42 = vmul.f32 %v635_v39, %v635_v39 }
 0x180   : > { %v631_v43 = vpop.f32.mrf.mxu0 }
 0x181   : > { %v1152_v45 = vpack.c.bf16 %v631_v43, %v628_v37  ;;  %656 = vadd.xlane.f32.xlu1 %v654_v42  ;;  %v636_v51 = vmul.f32 %v1362_v3, %v631_v43 }
 0x182   : > { %v1168_v48 = vpop.f32.mrf.mxu0 }
 0x183   : > { %1153 = vst [vmem:[%s1377_s0] sm:$0xff] %v1152_v45   ;;  %729 = vadd.xlane.f32.xlu0 %v717_v47  ;;  %v655_v52 = vmul.f32 %v636_v51, %v636_v51 }
 0x185   : > { %731 = vadd.xlane.f32.xlu1 %v718_v50 }
 0x187   : > { %649 = vadd.xlane.f32.xlu0 %v636_v51 }
 0x189   : > { %658 = vadd.xlane.f32.xlu1 %v655_v52 }
 0x18b   : > { %737 = vadd.xlane.f32.xlu0 %v735_v53 }
 0x18d   : > { %739 = vadd.xlane.f32.xlu1 %v736_v54 }
 0x208   : > { %v648_v55 = vpop.xlane.xlu0 %647 }
 0x209   : > { %652 = vst.msk [vmem:[%s1382_s12] sm:$0xff] %vm651_vm4, %v648_v55 }
 0x20a   : > { %v657_v56 = vpop.xlane.xlu1 %656 }
 0x20b   : > { %660 = vst.msk [vmem:[%s1387_s2] sm:$0xff] %vm651_vm4, %v657_v56 }
 0x20c   : > { %v730_v57 = vpop.xlane.xlu0 %729 }
 0x20d   : > { %733 = vst.msk [vmem:[%s1397_s28] sm:$0xff] %vm651_vm4, %v730_v57 }
 0x20e   : > { %v732_v58 = vpop.xlane.xlu1 %731 }
 0x20f   : > { %734 = vst.msk [vmem:[%s1397_s28 + $0x8] sm:$0xff] %vm651_vm4, %v732_v58 }
 0x210   : > { %v650_v59 = vpop.xlane.xlu0 %649 }
 0x211   : > { %653 = vst.msk [vmem:[%s1382_s12 + $0x8] sm:$0xff] %vm651_vm4, %v650_v59 }
 0x212   : > { %v659_v60 = vpop.xlane.xlu1 %658 }
 0x213   : > { %661 = vst.msk [vmem:[%s1387_s2 + $0x8] sm:$0xff] %vm651_vm4, %v659_v60 }
 0x214   : > { %v738_v61 = vpop.xlane.xlu0 %737 }
 0x215   : > { %741 = vst.msk [vmem:[%s1402_s14] sm:$0xff] %vm651_vm4, %v738_v61 }
 0x216   : > { %v740_v62 = vpop.xlane.xlu1 %739 }
 0x217   : > { %742 = vst.msk [vmem:[%s1402_s14 + $0x8] sm:$0xff] %vm651_vm4, %v740_v62 }
 0x218 PF: > { %s20_s13 = sadd.s32 1, %s1264_s13   ;;  %s1483_s10 = sld [smem:[#allocation3_spill]] }
 0x219   : > { %p17_p8 = scmp.ge.s32.totalorder %s20_s13, 6   ;;  %s1484_s0 = sld [smem:[#allocation4_spill]] }
 0x21a   : > { %s1485_s12 = sld [smem:[#allocation5_spill]]  ;;  %s1486_s30 = smov %s1256_s11 }
 0x21b   :  { %19 = sbr.rel (!%p17_p8) target bundleno = 4 (0x4), region = 140 }
 0x21f   : > { %s1487_s11 = smov %s1484_s0 }

// kernel: block_forward.7
= control target key start
LH: loop header
LB: loop body
LE: loop exit
PB: predicated region body
PF: predicated region fallthrough
CT: control target
= control target key end

     0   :  { %s515_s15 = smov 0   ;;  %s591_s0 = inlined_call_operand.vmem [shape: bf16[2,32,128], index: 0, kind: input, shape index: {}]   ;;  %s592_s1 = inlined_call_operand.vmem [shape: bf16[2,32,128], index: 1, kind: input, shape index: {}]   ;;  %s593_s2 = inlined_call_operand.vmem [shape: f32[2,32,1], index: 2, kind: input, shape index: {}]   ;;  %s594_s3 = inlined_call_operand.vmem [shape: f32[2,32,1], index: 3, kind: input, shape index: {}]   ;;  %s595_s4 = inlined_call_operand.vmem [shape: f32[2,32,16], index: 4, kind: output, shape index: {}]  }
   0x1 LB: > { %s428_s16 = sadd.s32 4294967295, %s487_s15   ;;  %p432_p0 = scmp.ge.s32.totalorder %s487_s15, 1  ;;  %s487_s15 = sphi %s515_s15, %s14_s15  }
   0x2   : > { %p172_p1 = scmp.lt.s32.totalorder %s487_s15, 3 }
   0x4   : > { %p173_p2 = pnand %p432_p0, %p172_p1 }
   0x5   : > { %p203_p3 = scmp.lt.s32.totalorder (!%p173_p2), %s428_s16, 1 }
   0x6   : > { %176 = sbr.rel (%p173_p2) target bundleno = 172 (0xac), region = 36 }
   0xb   : > { %v228_v0 = vld [vmem:[%s593_s2 + $0x10] sm:$0xff]  ;;  %v226_v1 = vld [vmem:[%s593_s2] sm:$0xff]  ;;  %v489_v2 = vmov 0   ;;  %v229_v3 = vld [vmem:[%s593_s2 + $0x18] sm:$0xff]  ;;  %s597_s16 = smov (!%p203_p3, %s428_s16), 1  ;;  %vm356_vm0 = vcmask 130048  }
   0xc   : > { %480 = vset.pattern.permute.xlu1 %v489_v2  ;;  %479 = vset.pattern.permute.xlu0 %v489_v2  ;;  %v227_v4 = vld [vmem:[%s593_s2 + $0x8] sm:$0xff]  ;;  %v291_v6 = vld [vmem:[%s594_s3] sm:$0xff]  ;;  %v294_v7 = vld [vmem:[%s594_s3 + $0x18] sm:$0xff]  ;;  %s449_s25 = sshll.u32 %s597_s16, 4  ;;  %s451_s6 = sshll.u32 %s597_s16, 5 }
   0xd   : > { %242 = vperm.xlu1 %480, %v228_v0   ;;  %232 = vperm.xlu0 %479, %v226_v1   ;;  %v292_v5 = vld [vmem:[%s594_s3 + $0x8] sm:$0xff]  ;;  %v293_v8 = vld [vmem:[%s594_s3 + $0x10] sm:$0xff]  ;;  %v439_v10 = vld [vmem:[%s593_s2 + $0x20] sm:$0xff]  ;;  %s207_s28 = scalar_lea.vmem %s591_s0, %s449_s25  ;;  %s212_s5 = scalar_lea.vmem %s592_s1, %s449_s25 }
   0xe   : > { %v440_v9 = vld [vmem:[%s593_s2 + $0x28] sm:$0xff]  ;;  %v442_v11 = vld [vmem:[%s593_s2 + $0x38] sm:$0xff]  ;;  %v441_v12 = vld [vmem:[%s593_s2 + $0x30] sm:$0xff]  ;;  %s217_s9 = scalar_lea.vmem %s595_s4, %s451_s6 }
   0xf   : > { %v444_v13 = vld [vmem:[%s594_s3 + $0x28] sm:$0xff]  ;;  %v443_v14 = vld [vmem:[%s594_s3 + $0x20] sm:$0xff]  ;;  %v446_v15 = vld [vmem:[%s594_s3 + $0x38] sm:$0xff] }
  0x10   : > { %v445_v16 = vld [vmem:[%s594_s3 + $0x30] sm:$0xff]  ;;  %v453_v25 = vld [vmem:[%s207_s28] sm:$0xff]   ;;  %v468_v29 = vld [vmem:[%s207_s28 + $0x8] sm:$0xff]  }
  0x11   : > { %247 = vperm.xlu1 %480, %v229_v3   ;;  %237 = vperm.xlu0 %479, %v227_v4   ;;  %v461_v26 = vld [vmem:[%s212_s5] sm:$0xff]   ;;  %v454_v30 = vunpack.c.l.bf16 %v453_v25  ;;  %v455_v31 = vunpack.c.h.bf16 %v453_v25  ;;  %v469_v34 = vld [vmem:[%s212_s5 + $0x8] sm:$0xff]   ;;  %v458_v37 = vunpack.c.l.bf16 %v468_v29  ;;  %v459_v38 = vunpack.c.h.bf16 %v468_v29 }
  0x12   : > { %v463_v32 = vunpack.c.h.bf16 %v461_v26  ;;  %v462_v33 = vunpack.c.l.bf16 %v461_v26  ;;  %v467_v39 = vunpack.c.h.bf16 %v469_v34  ;;  %v466_v40 = vunpack.c.l.bf16 %v469_v34 }
  0x15   : > { %302 = vperm.xlu1 %480, %v292_v5   ;;  %297 = vperm.xlu0 %479, %v291_v6  }
  0x19   : > { %312 = vperm.xlu1 %480, %v294_v7   ;;  %307 = vperm.xlu0 %479, %v293_v8  }
  0x1d   : > { %266 = vperm.xlu1 %480, %v440_v9   ;;  %261 = vperm.xlu0 %479, %v439_v10  }
  0x21   : > { %276 = vperm.xlu1 %480, %v442_v11   ;;  %271 = vperm.xlu0 %479, %v441_v12  }
  0x25   : > { %331 = vperm.xlu1 %480, %v444_v13   ;;  %326 = vperm.xlu0 %479, %v443_v14  }
  0x29   : > { %341 = vperm.xlu1 %480, %v446_v15   ;;  %336 = vperm.xlu0 %479, %v445_v16  }
  0x88   : > { %v243_v17 = vpop.permute.xlu1 %242  ;;  %v233_v18 = vpop.permute.xlu0 %232 }
  0x89   : > { %v250_v41 = vmul.f32 %v454_v30, %v233_v18  ;;  %v252_v51 = vmul.f32 %v458_v37, %v243_v17 }
  0x8c   : > { %v248_v19 = vpop.permute.xlu1 %247  ;;  %v238_v20 = vpop.permute.xlu0 %237 }
  0x8d   : > { %v251_v42 = vmul.f32 %v455_v31, %v238_v20  ;;  %v253_v52 = vmul.f32 %v459_v38, %v248_v19 }
  0x90   : > { %v303_v21 = vpop.permute.xlu1 %302  ;;  %v298_v22 = vpop.permute.xlu0 %297 }
  0x91   : > { %v316_v43 = vmul.f32 %v463_v32, %v303_v21  ;;  %v315_v44 = vmul.f32 %v462_v33, %v298_v22 }
  0x94   : > { %v313_v23 = vpop.permute.xlu1 %312  ;;  %v308_v24 = vpop.permute.xlu0 %307 }
  0x95   : > { %v318_v53 = vmul.f32 %v467_v39, %v313_v23  ;;  %v317_v54 = vmul.f32 %v466_v40, %v308_v24 }
  0x98   : > { %v267_v27 = vpop.permute.xlu1 %266  ;;  %v262_v28 = vpop.permute.xlu0 %261 }
  0x99   : > { %v280_v47 = vadd.f32 %v267_v27, %v251_v42  ;;  %v279_v48 = vadd.f32 %v262_v28, %v250_v41 }
  0x9c   : > { %v277_v35 = vpop.permute.xlu1 %276  ;;  %v272_v36 = vpop.permute.xlu0 %271 }
  0x9d   : > { %v282_v57 = vadd.f32 %v277_v35, %v253_v52  ;;  %v281_v58 = vadd.f32 %v272_v36, %v252_v51 }
  0xa0   : > { %v332_v45 = vpop.permute.xlu1 %331  ;;  %v327_v46 = vpop.permute.xlu0 %326 }
  0xa1   : > { %v345_v49 = vadd.f32 %v332_v45, %v316_v43  ;;  %v344_v50 = vadd.f32 %v327_v46, %v315_v44 }
  0xa3   : > { %v349_v55 = vadd.f32 %v345_v49, %v280_v47  ;;  %v348_v56 = vadd.f32 %v344_v50, %v279_v48 }
  0xa4   : > { %v342_v59 = vpop.permute.xlu1 %341  ;;  %v337_v60 = vpop.permute.xlu0 %336 }
  0xa5   : > { %v353_v61 = vmax.f32 %v349_v55, 0.0  ;;  %v352_v62 = vmax.f32 %v348_v56, 0.0  ;;  %v347_v63 = vadd.f32 %v342_v59, %v318_v53  ;;  %v346_v0 = vadd.f32 %v337_v60, %v317_v54 }
  0xa7   : > { %358 = vst.msk [vmem:[%s217_s9 + $0x8] sm:$0xff] %vm356_vm0, %v353_v61  ;;  %357 = vst.msk [vmem:[%s217_s9] sm:$0xff] %vm356_vm0, %v352_v62  ;;  %v351_v1 = vadd.f32 %v347_v63, %v282_v57  ;;  %v350_v2 = vadd.f32 %v346_v0, %v281_v58 }
  0xa9   : > { %v355_v3 = vmax.f32 %v351_v1, 0.0  ;;  %v354_v4 = vmax.f32 %v350_v2, 0.0 }
  0xab   : > { %360 = vst.msk [vmem:[%s217_s9 + $0x18] sm:$0xff] %vm356_vm0, %v355_v3  ;;  %359 = vst.msk [vmem:[%s217_s9 + $0x10] sm:$0xff] %vm356_vm0, %v354_v4 }
  0xac PF: > { %s14_s15 = sadd.s32 1, %s487_s15  }
  0xad   : > { %p11_p4 = scmp.ge.s32.totalorder %s14_s15, 4  }
  0xaf   :  { %13 = sbr.rel (!%p11_p4) target bundleno = 1 (0x1), region = 71 }

// kernel: block_forward.5
= control target key start
LH: loop header
LB: loop body
LE: loop exit
PB: predicated region body
PF: predicated region fallthrough
CT: control target
= control target key end

     0   :  { %s1159_s21 = smov 0   ;;  %s1161_s22 = smov 0   ;;  %s1351_s0 = inlined_call_operand.vmem [shape: bf16[2,32,128], index: 0, kind: input, shape index: {}]   ;;  %s1352_s1 = inlined_call_operand.vmem [shape: f32[5,32,1], index: 1, kind: input, shape index: {}]   ;;  %s1353_s2 = inlined_call_operand.vmem [shape: bf16[32,32], index: 2, kind: input, shape index: {}]   ;;  %s1354_s3 = inlined_call_operand.vmem [shape: f32[2,32,1], index: 3, kind: input, shape index: {}]   ;;  %s1355_s4 = inlined_call_operand.vmem [shape: bf16[2,32,128], index: 4, kind: output, shape index: {0}]   ;;  %s1356_s5 = inlined_call_operand.vmem [shape: f32[2,32,1], index: 5, kind: output, shape index: {1}]   ;;  %s1357_s6 = inlined_call_operand.vmem [shape: f32[2,32,1], index: 6, kind: output, shape index: {2}]  }
   0x1   :  { %1358 = sst [smem:[#allocation3_spill]] %s1351_s0  ;;  %s1163_s23 = smov 0  }
   0x2   :  { %s1165_s24 = smov 0   ;;  %s1167_s25 = smov 0  }
   0x3 LB: > { %s26_s26 = sadd.s32 1, %s1107_s23  ;;  %s29_s27 = sadd.s32 1, %s1111_s24  ;;  %s1115_s25 = sphi %s1167_s25, %s17_s25   ;;  %s1111_s24 = sphi %s1165_s24, %s1363_s24   ;;  %s1107_s23 = sphi %s1163_s23, %s1362_s23   ;;  %s1103_s22 = sphi %s1161_s22, %s1361_s22   ;;  %s1099_s21 = sphi %s1159_s21, %s1360_s21  }
   0x4   : > { %p27_p0 = scmp.ge.s32.totalorder %s26_s26, 2  ;;  %p934_p1 = scmp.ge.s32.totalorder %s1115_s25, 1 }
   0x5   : > { %p246_p2 = scmp.lt.s32.totalorder %s1115_s25, 5 }
   0x6   : > { %s1365_s26 = smov (%p27_p0, %s26_s26), 0  ;;  %s1367_s27 = smov (!%p27_p0, %s29_s27), %s1111_s24 }
   0x7   : > { %p247_p3 = pnand %p934_p1, %p246_p2  ;;  %p31_p4 = scmp.ge.s32.totalorder %s1367_s27, 2 }
   0x8   : > { %p303_p5 = scmp.lt.s32.totalorder (!%p247_p3), %s1103_s22, 1  ;;  %s937_s28 = sshll.u32 (!%p247_p3), %s1099_s21, 1 }
   0x9   : > { %s1369_s27 = smov (%p31_p4, %s1367_s27), 0  ;;  %250 = sbr.rel (%p247_p3) target bundleno = 669 (0x29d), region = 36 }
   0xa   : > { %p309_p6 = scmp.lt.s32.totalorder (!%p247_p3), %s937_s28, 3  ;;  %s1359_s0 = sld [smem:[#allocation3_spill]] (!%p247_p3) }
   0xb   : > { %p949_p7 = scmp.ne.s32.totalorder (!%p247_p3), %s1099_s21, 0 }
   0xe   : > { %v345_v0 = vlaneseq  ;;  %s1371_s22 = smov (!%p303_p5, %s1103_s22), 1  ;;  %s1373_s28 = smov (!%p309_p6, %s937_s28), 3  ;;  %v1117_v2 = vmov 0.0  }
   0xf   : > { %s982_s29 = sshll.u32 %s1371_s22, 4  ;;  %s940_s30 = sshll.u32 %s1371_s22, 2 }
  0x10   : > { %v346_v1 = vand.u32 127, %v345_v0  ;;  %s1195_s9 = scalar_lea.vmem %s1359_s0, %s982_s29  ;;  %s938_s10 = sshll.u32 %s1373_s28, 2 }
  0x11   : > { %s1203_s13 = scalar_lea.vmem %s1353_s2, %s938_s10  ;;  %s320_s14 = sadd.s32 %s940_s30, %s1373_s28 }
  0x12   : > { %vm347_vm0 = vcmp.lt.s32.totalorder %v346_v1, 16  ;;  %s941_s15 = sshll.u32 %s320_s14, 2  ;;  %s944_s16 = sshll.u32 %s320_s14, 3 }
  0x13   : > { %v1198_v3 = vsel %vm347_vm0, 1.0, %v1117_v2  ;;  %s1208_s19 = scalar_lea.vmem %s1355_s4, %s941_s15  ;;  %s1213_s29 = scalar_lea.vmem %s1356_s5, %s944_s16 }
  0x14   : > { %s1218_s0 = scalar_lea.vmem %s1357_s6, %s944_s16  ;;  %353 = sbr.rel (%p949_p7) target bundleno = 315 (0x13b), region = 40 }
  0x15   : > { %s1120_s20 = smov (!%p949_p7), 1   ;;  %s1121_s22 = smov (!%p949_p7), 127  }
  0x16   : > { %s1122_s7 = smov (!%p949_p7), 126  }
  0x19   : > { %v364_v4 = vld [vmem:[%s1354_s3 + $0x10] sm:$0xff]  ;;  %v362_v5 = vld [vmem:[%s1354_s3] sm:$0xff]  ;;  %v1118_v6 = vmov 0   ;;  %v365_v7 = vld [vmem:[%s1354_s3 + $0x18] sm:$0xff] }
  0x1a   : > { %1073 = vset.pattern.permute.xlu1 %v1118_v6  ;;  %1072 = vset.pattern.permute.xlu0 %v1118_v6  ;;  %v363_v8 = vld [vmem:[%s1354_s3 + $0x8] sm:$0xff]  ;;  %v950_v10 = vld [vmem:[%s1354_s3 + $0x20] sm:$0xff]  ;;  %v953_v11 = vld [vmem:[%s1354_s3 + $0x38] sm:$0xff] }
  0x1b   : > { %378 = vperm.xlu1 %1073, %v364_v4   ;;  %368 = vperm.xlu0 %1072, %v362_v5   ;;  %v951_v9 = vld [vmem:[%s1354_s3 + $0x28] sm:$0xff]  ;;  %v952_v12 = vld [vmem:[%s1354_s3 + $0x30] sm:$0xff]  ;;  %v954_v14 = vld [vmem:[%s1352_s1 + $0x40] sm:$0xff] }
  0x1c   : > { %v955_v13 = vld [vmem:[%s1352_s1 + $0x48] sm:$0xff]  ;;  %v957_v15 = vld [vmem:[%s1352_s1 + $0x58] sm:$0xff]  ;;  %v956_v16 = vld [vmem:[%s1352_s1 + $0x50] sm:$0xff] }
  0x1d   : > { %v465_v17 = vld [vmem:[%s1352_s1 + $0x8] sm:$0xff]  ;;  %v464_v18 = vld [vmem:[%s1352_s1] sm:$0xff]  ;;  %v467_v19 = vld [vmem:[%s1352_s1 + $0x18] sm:$0xff] }
  0x1e   : > { %v466_v20 = vld [vmem:[%s1352_s1 + $0x10] sm:$0xff]  ;;  %v959_v21 = vld [vmem:[%s1352_s1 + $0x28] sm:$0xff]  ;;  %v958_v22 = vld [vmem:[%s1352_s1 + $0x20] sm:$0xff] }
  0x1f   : > { %383 = vperm.xlu1 %1073, %v365_v7   ;;  %373 = vperm.xlu0 %1072, %v363_v8   ;;  %v961_v23 = vld [vmem:[%s1352_s1 + $0x38] sm:$0xff]  ;;  %v960_v24 = vld [vmem:[%s1352_s1 + $0x30] sm:$0xff]  ;;  %v963_v25 = vld [vmem:[%s1352_s1 + $0x68] sm:$0xff] }
  0x20   : > { %v962_v26 = vld [vmem:[%s1352_s1 + $0x60] sm:$0xff]  ;;  %v965_v27 = vld [vmem:[%s1352_s1 + $0x78] sm:$0xff]  ;;  %v964_v28 = vld [vmem:[%s1352_s1 + $0x70] sm:$0xff] }
  0x21   : > { %v967_v29 = vld [vmem:[%s1352_s1 + $0x88] sm:$0xff]  ;;  %v966_v30 = vld [vmem:[%s1352_s1 + $0x80] sm:$0xff]  ;;  %v969_v31 = vld [vmem:[%s1352_s1 + $0x98] sm:$0xff] }
  0x22   : > { %v968_v32 = vld [vmem:[%s1352_s1 + $0x90] sm:$0xff]  ;;  %v990_v35 = vld [vmem:[%s1195_s9] sm:$0xff]   ;;  %v1012_v38 = vld [vmem:[%s1195_s9 + $0x8] sm:$0xff]   ;;  %s1119_s9 = smov 2  }
  0x23   : > { %402 = vperm.xlu1 %1073, %v951_v9   ;;  %397 = vperm.xlu0 %1072, %v950_v10   ;;  %v991_v36 = vunpack.c.l.bf16 %v990_v35  ;;  %v992_v37 = vunpack.c.h.bf16 %v990_v35  ;;  %v995_v41 = vunpack.c.l.bf16 %v1012_v38  ;;  %v996_v43 = vunpack.c.h.bf16 %v1012_v38 }
  0x27   : > { %412 = vperm.xlu1 %1073, %v953_v11   ;;  %407 = vperm.xlu0 %1072, %v952_v12  }
  0x2b   : > { %439 = vperm.xlu1 %1073, %v955_v13   ;;  %434 = vperm.xlu0 %1072, %v954_v14  }
  0x2f   : > { %449 = vperm.xlu1 %1073, %v957_v15   ;;  %444 = vperm.xlu0 %1072, %v956_v16  }
  0x33   : > { %475 = vperm.xlu1 %1073, %v465_v17   ;;  %470 = vperm.xlu0 %1072, %v464_v18  }
  0x37   : > { %485 = vperm.xlu1 %1073, %v467_v19   ;;  %480 = vperm.xlu0 %1072, %v466_v20  }
  0x3b   : > { %516 = vperm.xlu1 %1073, %v959_v21   ;;  %511 = vperm.xlu0 %1072, %v958_v22  }
  0x3f   : > { %526 = vperm.xlu1 %1073, %v961_v23   ;;  %521 = vperm.xlu0 %1072, %v960_v24  }
  0x43   : > { %557 = vperm.xlu1 %1073, %v963_v25   ;;  %552 = vperm.xlu0 %1072, %v962_v26  }
  0x47   : > { %567 = vperm.xlu1 %1073, %v965_v27   ;;  %562 = vperm.xlu0 %1072, %v964_v28  }
  0x4b   : > { %598 = vperm.xlu1 %1073, %v967_v29   ;;  %593 = vperm.xlu0 %1072, %v966_v30  }
  0x4f   : > { %608 = vperm.xlu1 %1073, %v969_v31   ;;  %603 = vperm.xlu0 %1072, %v968_v32  }
  0x96   : > { %v379_v33 = vpop.permute.xlu1 %378  ;;  %v369_v34 = vpop.permute.xlu0 %368 }
  0x97   : > { %v386_v42 = vmul.f32 %v991_v36, %v369_v34  ;;  %v388_v49 = vmul.f32 %v995_v41, %v379_v33 }
  0x9a   : > { %v384_v39 = vpop.permute.xlu1 %383  ;;  %v374_v40 = vpop.permute.xlu0 %373 }
  0x9b   : > { %v387_v44 = vmul.f32 %v992_v37, %v374_v40  ;;  %v389_v50 = vmul.f32 %v996_v43, %v384_v39 }
  0x9e   : > { %v403_v45 = vpop.permute.xlu1 %402  ;;  %v398_v46 = vpop.permute.xlu0 %397 }
  0x9f   : > { %v416_v47 = vadd.f32 %v403_v45, %v387_v44  ;;  %v415_v48 = vadd.f32 %v398_v46, %v386_v42 }
  0xa1   : > { %v420_v51 = vmax.f32 %v416_v47, 0.0  ;;  %v419_v52 = vmax.f32 %v415_v48, 0.0 }
  0xa2   : > { %v413_v53 = vpop.permute.xlu1 %412  ;;  %v408_v54 = vpop.permute.xlu0 %407 }
  0xa3   : > { %v424_v55 = vmul.f32 %v1198_v3, %v420_v51  ;;  %v423_v56 = vmul.f32 %v1198_v3, %v419_v52  ;;  %v418_v57 = vadd.f32 %v413_v53, %v389_v50  ;;  %v417_v58 = vadd.f32 %v408_v54, %v388_v49 }
  0xa5   : > { %v422_v59 = vmax.f32 %v418_v57, 0.0  ;;  %v421_v60 = vmax.f32 %v417_v58, 0.0  ;;  %458 = vrot.lane.b32.xlu1 %v424_v55, %s1119_s9  ;;  %456 = vrot.lane.b32.xlu0 %v423_v56, %s1119_s9 }
  0xa6   : > { %v440_v63 = vpop.permute.xlu1 %439  ;;  %v435_v0 = vpop.permute.xlu0 %434 }
  0xa7   : > { %v1310_v61 = vmul.f32 %v1198_v3, %v422_v59  ;;  %v1313_v62 = vmul.f32 %v1198_v3, %v421_v60  ;;  %v453_v33 = vmul.f32 %v440_v63, %v424_v55  ;;  %v452_v35 = vmul.f32 %v435_v0, %v423_v56 }
  0xa9   : > { %462 = vrot.lane.b32.xlu1 %v1310_v61, %s1119_s9  ;;  %460 = vrot.lane.b32.xlu0 %v1313_v62, %s1119_s9 }
  0xaa   : > { %v450_v1 = vpop.permute.xlu1 %449  ;;  %v445_v4 = vpop.permute.xlu0 %444 }
  0xab   : > { %v455_v45 = vmul.f32 %v450_v1, %v1310_v61  ;;  %v454_v46 = vmul.f32 %v445_v4, %v1313_v62 }
  0xad   : > { %498 = vrot.lane.b32.xlu1 %v424_v55, %s1120_s20  ;;  %496 = vrot.lane.b32.xlu0 %v423_v56, %s1120_s20 }
  0xae   : > { %v476_v5 = vpop.permute.xlu1 %475  ;;  %v471_v6 = vpop.permute.xlu0 %470 }
  0xb1   : > { %502 = vrot.lane.b32.xlu1 %v1310_v61, %s1120_s20  ;;  %500 = vrot.lane.b32.xlu0 %v1313_v62, %s1120_s20 }
  0xb2   : > { %v486_v7 = vpop.permute.xlu1 %485  ;;  %v481_v8 = vpop.permute.xlu0 %480 }
  0xb5   : > { %539 = vrot.lane.b32.xlu1 %v424_v55, %s1121_s22  ;;  %537 = vrot.lane.b32.xlu0 %v423_v56, %s1121_s22 }
  0xb6   : > { %v517_v9 = vpop.permute.xlu1 %516  ;;  %v512_v10 = vpop.permute.xlu0 %511 }
  0xb9   : > { %543 = vrot.lane.b32.xlu1 %v1310_v61, %s1121_s22  ;;  %541 = vrot.lane.b32.xlu0 %v1313_v62, %s1121_s22 }
  0xba   : > { %v527_v11 = vpop.permute.xlu1 %526  ;;  %v522_v12 = vpop.permute.xlu0 %521 }
  0xbd   : > { %580 = vrot.lane.b32.xlu1 %v424_v55, %s1122_s7  ;;  %578 = vrot.lane.b32.xlu0 %v423_v56, %s1122_s7 }
  0xbe   : > { %v558_v13 = vpop.permute.xlu1 %557  ;;  %v553_v14 = vpop.permute.xlu0 %552 }
  0xc1   : > { %584 = vrot.lane.b32.xlu1 %v1310_v61, %s1122_s7  ;;  %582 = vrot.lane.b32.xlu0 %v1313_v62, %s1122_s7 }
  0xc2   : > { %v568_v15 = vpop.permute.xlu1 %567  ;;  %v563_v16 = vpop.permute.xlu0 %562 }
  0xc6   : > { %v599_v17 = vpop.permute.xlu1 %598  ;;  %v594_v18 = vpop.permute.xlu0 %593 }
  0xca   : > { %v609_v19 = vpop.permute.xlu1 %608  ;;  %v604_v20 = vpop.permute.xlu0 %603 }
 0x117   : > { %v459_v21 = vpop.permute.xlu1 %458  ;;  %v457_v22 = vpop.permute.xlu0 %456 }
 0x118   : > { %v489_v29 = vmul.f32 %v476_v5, %v459_v21  ;;  %v488_v32 = vmul.f32 %v471_v6, %v457_v22 }
 0x11a   : > { %v493_v37 = vadd.f32 %v489_v29, %v453_v33  ;;  %v492_v43 = vadd.f32 %v488_v32, %v452_v35 }
 0x11b   : > { %v463_v23 = vpop.permute.xlu1 %462  ;;  %v461_v24 = vpop.permute.xlu0 %460 }
 0x11c   : > { %v491_v38 = vmul.f32 %v486_v7, %v463_v23  ;;  %v490_v39 = vmul.f32 %v481_v8, %v461_v24 }
 0x11e   : > { %v495_v51 = vadd.f32 %v491_v38, %v455_v45  ;;  %v494_v52 = vadd.f32 %v490_v39, %v454_v46 }
 0x11f   : > { %v499_v25 = vpop.permute.xlu1 %498  ;;  %v497_v26 = vpop.permute.xlu0 %496 }
 0x120   : > { %v530_v34 = vmul.f32 %v517_v9, %v499_v25  ;;  %v529_v36 = vmul.f32 %v512_v10, %v497_v26 }
 0x122   : > { %v534_v47 = vadd.f32 %v530_v34, %v493_v37  ;;  %v533_v49 = vadd.f32 %v529_v36, %v492_v43 }
 0x123   : > { %v503_v27 = vpop.permute.xlu1 %502  ;;  %v501_v28 = vpop.permute.xlu0 %500 }
 0x124   : > { %v532_v48 = vmul.f32 %v527_v11, %v503_v27  ;;  %v531_v50 = vmul.f32 %v522_v12, %v501_v28 }
 0x126   : > { %v536_v63 = vadd.f32 %v532_v48, %v495_v51  ;;  %v535_v0 = vadd.f32 %v531_v50, %v494_v52 }
 0x127   : > { %v540_v30 = vpop.permute.xlu1 %539  ;;  %v538_v31 = vpop.permute.xlu0 %537 }
 0x128   : > { %v571_v40 = vmul.f32 %v558_v13, %v540_v30  ;;  %v570_v44 = vmul.f32 %v553_v14, %v538_v31 }
 0x12a   : > { %v575_v53 = vadd.f32 %v571_v40, %v534_v47  ;;  %v574_v57 = vadd.f32 %v570_v44, %v533_v49 }
 0x12b   : > { %v544_v41 = vpop.permute.xlu1 %543  ;;  %v542_v42 = vpop.permute.xlu0 %541 }
 0x12c   : > { %v573_v54 = vmul.f32 %v568_v15, %v544_v41  ;;  %v572_v58 = vmul.f32 %v563_v16, %v542_v42 }
 0x12e   : > { %v577_v1 = vadd.f32 %v573_v54, %v536_v63  ;;  %v576_v6 = vadd.f32 %v572_v58, %v535_v0 }
 0x12f   : > { %v581_v55 = vpop.permute.xlu1 %580  ;;  %v579_v56 = vpop.permute.xlu0 %578 }
 0x130   : > { %v612_v59 = vmul.f32 %v599_v17, %v581_v55  ;;  %v611_v60 = vmul.f32 %v594_v18, %v579_v56 }
 0x132   : > { %v616_v5 = vadd.f32 %v612_v59, %v575_v53  ;;  %v615_v61 = vadd.f32 %v611_v60, %v574_v57 }
 0x133   : > { %v585_v62 = vpop.permute.xlu1 %584  ;;  %v583_v4 = vpop.permute.xlu0 %582 }
 0x134   : > { %v1000_v7 = vpack.c.bf16 %v616_v5, %v615_v61  ;;  %v614_v8 = vmul.f32 %v609_v19, %v585_v62  ;;  %v613_v9 = vmul.f32 %v604_v20, %v583_v4 }
 0x136   : > { %1001 = vst [vmem:[#allocation2] sm:$0xff] %v1000_v7   ;;  %v618_v10 = vadd.f32 %v614_v8, %v577_v1  ;;  %v617_v11 = vadd.f32 %v613_v9, %v576_v6 }
 0x138   : > { %v1005_v12 = vpack.c.bf16 %v618_v10, %v617_v11 }
 0x13a   : > { %1013 = vst [vmem:[#allocation2 + $0x8] sm:$0xff] %v1005_v12  }
 0x13b PF: > { %1017 = vmatprep.subr.bf16.mxu0 %v1117_v2  ;;  %vm1123_vm1 = vmmov 0   ;;  %v1076_v15 = vld [vmem:[%s1203_s13] sm:$0xff]   ;;  %vm662_vm2 = vcmask 261120   ;;  %vm723_vm3 = vcmask 7168  }
 0x13c   : > { %1021 = vmatprep.mubr.msk.bf16.mxu0 %vm1123_vm1, %v1117_v2 }
 0x13d   : > { %v1075_v14 = vld [vmem:[#allocation2] sm:$0xff]  }
 0x141   : > { %v1074_v13 = vld [vmem:[#allocation2 + $0x8] sm:$0xff]  }
 0x142   : > { %1018 = vmatpush3.bf16.msra.mxu0 %v1074_v13 }
 0x143   : > { %1019 = vmatprep.subr.bf16.mxu0 %v1117_v2 }
 0x146   : > { %1020 = vmatpush3.bf16.msra.mxu0 %v1075_v14 }
 0x149   : > { %1022 = vmatmul.mubr.msk.bf16.vlgmr.msra.gmra.mxu0 %vm662_vm2, %v1076_v15 }
 0x209   : > { %v700_v16 = vpop.f32.mrf.mxu0 }
 0x20a   : > { %v707_v17 = vmul.f32 %v1198_v3, %v700_v16 }
 0x20b   : > { %v1023_v18 = vpop.f32.mrf.mxu0 }
 0x20c   : > { %719 = vadd.xlane.f32.xlu0 %v707_v17  ;;  %v726_v19 = vmul.f32 %v707_v17, %v707_v17 }
 0x20d   : > { %v703_v20 = vpop.f32.mrf.mxu0 }
 0x20e   : > { %v1010_v21 = vpack.c.bf16 %v703_v20, %v700_v16  ;;  %728 = vadd.xlane.f32.xlu1 %v726_v19  ;;  %v708_v22 = vmul.f32 %v1198_v3, %v703_v20 }
 0x20f   : > { %v1024_v2 = vpop.f32.mrf.mxu0 }
 0x210   : > { %1011 = vst [vmem:[%s1208_s19] sm:$0xff] %v1010_v21   ;;  %721 = vadd.xlane.f32.xlu0 %v708_v22  ;;  %v727_v23 = vmul.f32 %v708_v22, %v708_v22 }
 0x212   : > { %730 = vadd.xlane.f32.xlu1 %v727_v23 }
 0x295   : > { %v720_v24 = vpop.xlane.xlu0 %719 }
 0x296   : > { %724 = vst.msk [vmem:[%s1213_s29] sm:$0xff] %vm723_vm3, %v720_v24 }
 0x297   : > { %v729_v25 = vpop.xlane.xlu1 %728 }
 0x298   : > { %732 = vst.msk [vmem:[%s1218_s0] sm:$0xff] %vm723_vm3, %v729_v25 }
 0x299   : > { %v722_v26 = vpop.xlane.xlu0 %721 }
 0x29a   : > { %725 = vst.msk [vmem:[%s1213_s29 + $0x8] sm:$0xff] %vm723_vm3, %v722_v26 }
 0x29b   : > { %v731_v27 = vpop.xlane.xlu1 %730 }
 0x29c   : > { %733 = vst.msk [vmem:[%s1218_s0 + $0x8] sm:$0xff] %vm723_vm3, %v731_v27 }
 0x29d PF: > { %s17_s25 = sadd.s32 1, %s1115_s25   ;;  %s1360_s21 = smov %s1107_s23 }
 0x29e   : > { %p14_p8 = scmp.ge.s32.totalorder %s17_s25, 6   ;;  %s1361_s22 = smov %s1111_s24 }
 0x29f   : > { %s1362_s23 = smov %s1365_s26  ;;  %s1363_s24 = smov %s1369_s27 }
 0x2a0   :  { %16 = sbr.rel (!%p14_p8) target bundleno = 3 (0x3), region = 102 }

</bundles_post_ra>
